<compile_context>
chip_gen: v5e
topology: v5e:2x2
jax: 0.10.0
libtpu: 0.0.40
codegen_flags: <defaults>
</compile_context>

<pallas_src>
import jax
import jax.numpy as jnp
from jax.experimental import pallas as pl
from jax.experimental.pallas import tpu as pltpu


def bottleneck_kernel(x_ref, xup_ref, xdn_ref, w1_ref, b1_ref, w2_ref, b2_ref,
                      w3_ref, b3_ref, o_ref, pad_ref):
    """One (tile_rows, W) slab of one batch element per grid step.

    x_ref    : (1, tH, W, Cin)  bf16  input row tile
    xup_ref  : (1, 1,  W, Cin)  bf16  input row just above the tile (clamped)
    xdn_ref  : (1, 1,  W, Cin)  bf16  input row just below the tile (clamped)
    w1_ref   : (Cin, Cw)        bf16  1x1 conv weight, BN1 scale folded in
    w2_ref   : (3, 3, Cw, Cw)   bf16  3x3 conv weight, BN2 scale folded in
    w3_ref   : (Cw, Cout)       bf16  1x1 conv weight, BN3 scale folded in
    b*_ref   : (1, C)           f32   folded BN biases
    o_ref    : (1, tH, W, Cout) bf16  output row tile
    pad_ref  : (tH+2, W, Cw)    bf16  t1 rows with a 1-row halo
    """
    _, tH, W, Cin = x_ref.shape
    Cw = w1_ref.shape[1]
    M = tH * W
    h = pl.program_id(1)
    nH = pl.num_programs(1)

    def conv1(xrows):  # (R, Cin) bf16 -> (R, Cw) f32, folded BN1 + ReLU
        y = jnp.dot(xrows, w1_ref[...], preferred_element_type=jnp.float32)
        return jnp.maximum(y + b1_ref[...], 0.0)

    # ---- conv1 (1x1) + folded BN1 + ReLU over the main rows ----------------
    t1 = conv1(x_ref[0].reshape(M, Cin))
    pad_ref[1:tH + 1] = t1.astype(jnp.bfloat16).reshape(tH, W, Cw)

    # ---- 1-row t1 halos recomputed from the neighbouring input rows; zero at
    #      the true image boundary (top of first tile / bottom of last tile).
    top = conv1(xup_ref[0, 0])
    bot = conv1(xdn_ref[0, 0])
    pad_ref[0] = jnp.where(h > 0, top, 0.0).astype(jnp.bfloat16)
    pad_ref[tH + 1] = jnp.where(h < nH - 1, bot, 0.0).astype(jnp.bfloat16)

    # ---- conv2 (3x3, stride 1, pad 1) + folded BN2 + ReLU -------------------
    # 9 MXU matmuls with K = Cw; W-direction taps built via zero-column concat.
    zcol = jnp.zeros((tH, 1, Cw), jnp.bfloat16)
    acc = jnp.zeros((M, Cw), jnp.float32)
    for ky in range(3):                                   # static, unrolled
        rows = pad_ref[ky:ky + tH]                        # (tH, W, Cw) bf16
        ctr = rows.reshape(M, Cw)
        sh_r = jnp.concatenate([zcol, rows[:, :W - 1, :]], axis=1).reshape(M, Cw)
        sh_l = jnp.concatenate([rows[:, 1:, :], zcol], axis=1).reshape(M, Cw)
        acc += jnp.dot(sh_r, w2_ref[ky, 0], preferred_element_type=jnp.float32)
        acc += jnp.dot(ctr, w2_ref[ky, 1], preferred_element_type=jnp.float32)
        acc += jnp.dot(sh_l, w2_ref[ky, 2], preferred_element_type=jnp.float32)
    t2 = jnp.maximum(acc + b2_ref[...], 0.0).astype(jnp.bfloat16)

    # ---- conv3 (1x1) + folded BN3 + residual (f32) + ReLU -------------------
    t3 = jnp.dot(t2, w3_ref[...], preferred_element_type=jnp.float32) + b3_ref[...]
    xr = x_ref[0].reshape(M, Cin).astype(jnp.float32)     # residual read, upcast
    out = jnp.maximum(t3 + xr, 0.0)
    o_ref[0] = out.reshape(tH, W, -1).astype(o_ref.dtype)


def fold_params(params):
    """Fold BN scales into conv weights (host side), cast weights to bf16."""
    w1, s1, b1, w2, s2, b2, w3, s3, b3 = params
    w1f = (w1 * s1).astype(jnp.bfloat16)                         # (Cin, Cw)
    w2f = (w2 * s2.reshape(1, 1, 1, -1)).astype(jnp.bfloat16)    # (3,3,Cw,Cw)
    w3f = (w3 * s3).astype(jnp.bfloat16)                         # (Cw, Cout)
    return (w1f, b1.astype(jnp.float32), w2f, b2.astype(jnp.float32),
            w3f, b3.astype(jnp.float32))


def _vmem_capacity_bytes():
    try:
        return int(pltpu.get_tpu_info().vmem_capacity_bytes)
    except Exception:
        return 64 * 1024 * 1024   # conservative fallback (v7x per-core VMEM)


def _pick_tile_rows(H, W, Cin, Cw, Cout, budget_bytes):
    """Largest row tile (a divisor of H) whose per-step working set fits."""
    def footprint(th):
        bf2, f4 = 2, 4
        x_blk = 2 * th * W * Cin * bf2           # double-buffered input block
        halo = 2 * 2 * W * Cin * bf2             # two 1-row halo blocks, x2
        o_blk = 2 * th * W * Cout * bf2          # double-buffered output block
        pad = (th + 2) * W * Cw * bf2            # im2col / halo scratch
        live = th * W * (2 * Cw + Cin + Cout) * f4   # rough f32 intermediates
        return x_blk + halo + o_blk + pad + live
    best = 1
    for th in range(1, H + 1):
        if H % th == 0 and footprint(th) <= budget_bytes:
            best = th
    return best


def bottleneck_nhwc(x, params, tile_rows=None):
    N, H, W, Cin = x.shape
    w1f, b1, w2f, b2, w3f, b3 = fold_params(params)
    Cw = w1f.shape[1]
    Cout = w3f.shape[1]
    assert Cin == Cout, "downsample=None requires inplanes == planes * 4"
    assert W % 8 == 0, "W must be a multiple of 8 (row-major reshape tiling)"

    # bf16 at the kernel boundary (a production model should already carry
    # activations in bf16 so this cast disappears).
    xb = x.astype(jnp.bfloat16)

    vmem_cap = _vmem_capacity_bytes()
    vmem_limit = min(int(0.75 * vmem_cap), 100 * 1024 * 1024)
    if tile_rows is None:
        tile_rows = _pick_tile_rows(H, W, Cin, Cw, Cout, vmem_limit // 2)
    tH = int(tile_rows)
    assert H % tH == 0, "H must be divisible by tile_rows"  # TODO(synk): ragged last tile
    nH = H // tH

    def full_spec(arr):
        nd = arr.ndim
        return pl.BlockSpec(arr.shape, lambda n, h, _nd=nd: (0,) * _nd)

    x_spec = pl.BlockSpec((1, tH, W, Cin), lambda n, h: (n, h, 0, 0))
    # 1-row halo windows above/below the tile: block size 1 along H so the
    # index map returns an element row index, clamped to the image; the
    # kernel substitutes zeros at the true image boundary.
    up_spec = pl.BlockSpec((1, 1, W, Cin),
                           lambda n, h: (n, jnp.maximum(h * tH - 1, 0), 0, 0))
    dn_spec = pl.BlockSpec((1, 1, W, Cin),
                           lambda n, h: (n, jnp.minimum((h + 1) * tH, H - 1), 0, 0))

    return pl.pallas_call(
        bottleneck_kernel,
        out_shape=jax.ShapeDtypeStruct((N, H, W, Cout), jnp.bfloat16),
        grid_spec=pltpu.PrefetchScalarGridSpec(
            num_scalar_prefetch=0,
            grid=(N, nH),
            in_specs=[
                x_spec, up_spec, dn_spec,
                full_spec(w1f), full_spec(b1),
                full_spec(w2f), full_spec(b2),
                full_spec(w3f), full_spec(b3),
            ],
            out_specs=pl.BlockSpec((1, tH, W, Cout), lambda n, h: (n, h, 0, 0)),
            scratch_shapes=[pltpu.VMEM((tH + 2, W, Cw), jnp.bfloat16)],
        ),
        compiler_params=pltpu.CompilerParams(
            dimension_semantics=("parallel", "parallel"),
            vmem_limit_bytes=vmem_limit,
        ),
    )(xb, xb, xb, w1f, b1, w2f, b2, w3f, b3)


def bottleneck_nchw(x_nchw, params, tile_rows=None):
    """PyTorch-layout compatibility wrapper (NCHW in / NCHW out).

    For production, keep the surrounding model in NHWC/bf16 and call
    `bottleneck_nhwc` directly to avoid the two full-tensor transposes.
    """
    x = jnp.transpose(x_nchw, (0, 2, 3, 1))       # NCHW -> NHWC
    y = bottleneck_nhwc(x, params, tile_rows=tile_rows)
    return jnp.transpose(y, (0, 3, 1, 2))          # NHWC -> NCHW


# ---------------------------------------------------------------------------
# Parameter construction (deterministic, synthetic) and pure-JAX reference.
# ---------------------------------------------------------------------------
def make_params(key, inplanes, planes, base_width=64, groups=1, expansion=4):
    width = int(planes * (base_width / 64.0)) * groups
    cout = planes * expansion
    ks = jax.random.split(key, 6)

    w1 = 0.1 * jax.random.normal(ks[0], (inplanes, width), jnp.float32)
    w2 = 0.1 * jax.random.normal(ks[1], (3, 3, width, width), jnp.float32)
    w3 = 0.1 * jax.random.normal(ks[2], (width, cout), jnp.float32)

    def bn_fold(k, c):
        k1, k2, k3, k4 = jax.random.split(k, 4)
        gamma = 1.0 + 0.1 * jax.random.normal(k1, (c,), jnp.float32)
        beta = 0.1 * jax.random.normal(k2, (c,), jnp.float32)
        mean = 0.1 * jax.random.normal(k3, (c,), jnp.float32)
        var = jnp.abs(jax.random.normal(k4, (c,), jnp.float32)) + 0.5
        scale = gamma / jnp.sqrt(var + 1e-5)
        bias = beta - mean * scale
        return scale.reshape(1, c), bias.reshape(1, c)

    s1, b1 = bn_fold(ks[3], width)
    s2, b2 = bn_fold(ks[4], width)
    s3, b3 = bn_fold(ks[5], cout)
    return (w1, s1, b1, w2, s2, b2, w3, s3, b3)


def reference_nhwc(x, w1, s1, b1, w2, s2, b2, w3, s3, b3):
    """Pure-JAX f32 reference with the original (unfolded) BN semantics."""
    dn = ('NHWC', 'HWIO', 'NHWC')
    cin, cw = w1.shape
    cout = w3.shape[1]
    y = jax.lax.conv_general_dilated(x, w1.reshape(1, 1, cin, cw),
                                     (1, 1), 'VALID', dimension_numbers=dn)
    y = jnp.maximum(y * s1.reshape(1, 1, 1, -1) + b1.reshape(1, 1, 1, -1), 0.0)
    y = jax.lax.conv_general_dilated(y, w2, (1, 1), ((1, 1), (1, 1)),
                                     dimension_numbers=dn)
    y = jnp.maximum(y * s2.reshape(1, 1, 1, -1) + b2.reshape(1, 1, 1, -1), 0.0)
    y = jax.lax.conv_general_dilated(y, w3.reshape(1, 1, cw, cout),
                                     (1, 1), 'VALID', dimension_numbers=dn)
    y = y * s3.reshape(1, 1, 1, -1) + b3.reshape(1, 1, 1, -1)
    return jnp.maximum(y + x, 0.0)


if __name__ == "__main__":
    key = jax.random.PRNGKey(0)
    k_x, k_p = jax.random.split(key)

    # Bottleneck(inplanes=64, planes=16) -> width=16, out channels = 64
    inplanes, planes = 64, 16
    N, H, W = 2, 16, 16

    x_nchw = jax.random.normal(k_x, (N, inplanes, H, W), jnp.float32)
    params = make_params(k_p, inplanes, planes)

    # tile_rows=8 forces 2 row tiles per image so the interior-halo path is
    # exercised; pass tile_rows=None to let the VMEM budget pick the tile.
    out = jax.block_until_ready(bottleneck_nchw(x_nchw, params, tile_rows=8))

    # Correctness check against the f32 pure-JAX reference.  The kernel uses
    # bf16 I/O and bf16 MXU operands (f32 accumulation + f32 residual), so
    # tolerance is loosened accordingly.
    x_nhwc = jnp.transpose(x_nchw, (0, 2, 3, 1))
    ref = jnp.transpose(reference_nhwc(x_nhwc, *params), (0, 3, 1, 2))
    assert out.shape == (N, planes * 4, H, W)
    out_f32 = out.astype(jnp.float32)
    assert jnp.allclose(out_f32, ref, rtol=5e-2, atol=5e-2), \
        float(jnp.max(jnp.abs(out_f32 - ref)))

    print("KERNEL_OK")
</pallas_src>

<mosaic_0001>
module attributes {stable_mosaic.version = 11 : i64} {
  func.func @bottleneck_kernel(%arg0: i32, %arg1: i32, %arg2: memref<1x8x16x64xbf16, #tpu.memory_space<vmem>>, %arg3: memref<1x1x16x64xbf16, #tpu.memory_space<vmem>>, %arg4: memref<1x1x16x64xbf16, #tpu.memory_space<vmem>>, %arg5: memref<64x16xbf16, #tpu.memory_space<vmem>>, %arg6: memref<1x16xf32, #tpu.memory_space<vmem>>, %arg7: memref<3x3x16x16xbf16, #tpu.memory_space<vmem>>, %arg8: memref<1x16xf32, #tpu.memory_space<vmem>>, %arg9: memref<16x64xbf16, #tpu.memory_space<vmem>>, %arg10: memref<1x64xf32, #tpu.memory_space<vmem>>, %arg11: memref<1x8x16x64xbf16, #tpu.memory_space<vmem>>, %arg12: memref<10x16x16xbf16, #tpu.memory_space<vmem>>) attributes {dimension_semantics = [#tpu.dimension_semantics<parallel>, #tpu.dimension_semantics<parallel>], iteration_bounds = array<i64: 2, 2>, scalar_prefetch = 0 : i64, scratch_operands = 1 : i64, tpu.core_type = #tpu.core_type<tc>, window_params = [{transform_indices = @transform_0, window_bounds = array<i64: 1, 8, 16, 64>}, {transform_indices = @transform_1, window_bounds = array<i64: 1, 1, 16, 64>}, {transform_indices = @transform_2, window_bounds = array<i64: 1, 1, 16, 64>}, {pipeline_mode = #tpu.pipeline_mode<synchronous>, transform_indices = @transform_3, window_bounds = array<i64: 64, 16>}, {pipeline_mode = #tpu.pipeline_mode<synchronous>, transform_indices = @transform_4, window_bounds = array<i64: 1, 16>}, {pipeline_mode = #tpu.pipeline_mode<synchronous>, transform_indices = @transform_5, window_bounds = array<i64: 3, 3, 16, 16>}, {pipeline_mode = #tpu.pipeline_mode<synchronous>, transform_indices = @transform_6, window_bounds = array<i64: 1, 16>}, {pipeline_mode = #tpu.pipeline_mode<synchronous>, transform_indices = @transform_7, window_bounds = array<i64: 16, 64>}, {pipeline_mode = #tpu.pipeline_mode<synchronous>, transform_indices = @transform_8, window_bounds = array<i64: 1, 64>}, {transform_indices = @transform_9, window_bounds = array<i64: 1, 8, 16, 64>}]} {
    %c0 = arith.constant 0 : index
    %c0_0 = arith.constant 0 : index
    %c0_1 = arith.constant 0 : index
    %c0_2 = arith.constant 0 : index
    %0 = vector.load %arg2[%c0, %c0_0, %c0_1, %c0_2] : memref<1x8x16x64xbf16, #tpu.memory_space<vmem>>, vector<1x8x16x64xbf16>
    %1 = vector.shape_cast %0 : vector<1x8x16x64xbf16> to vector<8x16x64xbf16>
    %2 = vector.shape_cast %1 : vector<8x16x64xbf16> to vector<128x64xbf16>
    %c0_3 = arith.constant 0 : index
    %c0_4 = arith.constant 0 : index
    %3 = vector.load %arg5[%c0_3, %c0_4] : memref<64x16xbf16, #tpu.memory_space<vmem>>, vector<64x16xbf16>
    %cst = arith.constant dense<0.000000e+00> : vector<128x16xf32>
    %4 = tpu.matmul %2, %3, %cst {dimension_numbers = #tpu.dot_dimension_numbers<[1], [0], [0], [1], [0, 0, 1, 1], [], []>} : vector<128x64xbf16>, vector<64x16xbf16>, vector<128x16xf32> -> vector<128x16xf32>
    %c0_5 = arith.constant 0 : index
    %c0_6 = arith.constant 0 : index
    %5 = vector.load %arg6[%c0_5, %c0_6] : memref<1x16xf32, #tpu.memory_space<vmem>>, vector<1x16xf32>
    %6 = vector.broadcast %5 : vector<1x16xf32> to vector<128x16xf32>
    %7 = arith.addf %4, %6 : vector<128x16xf32>
    %cst_7 = arith.constant 0.000000e+00 : f32
    %8 = vector.broadcast %cst_7 : f32 to vector<128x16xf32>
    %9 = arith.maximumf %7, %8 : vector<128x16xf32>
    %10 = arith.truncf %9 : vector<128x16xf32> to vector<128x16xbf16>
    %11 = vector.shape_cast %10 : vector<128x16xbf16> to vector<8x16x16xbf16>
    %c1 = arith.constant 1 : index
    %c0_8 = arith.constant 0 : index
    %c0_9 = arith.constant 0 : index
    %12 = vector.load %arg12[%c1, %c0_8, %c0_9] : memref<10x16x16xbf16, #tpu.memory_space<vmem>>, vector<8x16x16xbf16>
    tpu.vector_store %arg12[%c1, %c0_8, %c0_9], %11 {strides = array<i32>} : memref<10x16x16xbf16, #tpu.memory_space<vmem>>, vector<8x16x16xbf16>,
    %c0_10 = arith.constant 0 : index
    %c0_11 = arith.constant 0 : index
    %c0_12 = arith.constant 0 : index
    %c0_13 = arith.constant 0 : index
    %13 = vector.load %arg3[%c0_10, %c0_11, %c0_12, %c0_13] : memref<1x1x16x64xbf16, #tpu.memory_space<vmem>>, vector<1x1x16x64xbf16>
    %14 = vector.shape_cast %13 : vector<1x1x16x64xbf16> to vector<16x64xbf16>
    %c0_14 = arith.constant 0 : index
    %c0_15 = arith.constant 0 : index
    %15 = vector.load %arg5[%c0_14, %c0_15] : memref<64x16xbf16, #tpu.memory_space<vmem>>, vector<64x16xbf16>
    %cst_16 = arith.constant dense<0.000000e+00> : vector<16x16xf32>
    %16 = tpu.matmul %14, %15, %cst_16 {dimension_numbers = #tpu.dot_dimension_numbers<[1], [0], [0], [1], [0, 0, 1, 1], [], []>} : vector<16x64xbf16>, vector<64x16xbf16>, vector<16x16xf32> -> vector<16x16xf32>
    %c0_17 = arith.constant 0 : index
    %c0_18 = arith.constant 0 : index
    %17 = vector.load %arg6[%c0_17, %c0_18] : memref<1x16xf32, #tpu.memory_space<vmem>>, vector<1x16xf32>
    %18 = vector.broadcast %17 : vector<1x16xf32> to vector<16x16xf32>
    %19 = arith.addf %16, %18 : vector<16x16xf32>
    %cst_19 = arith.constant 0.000000e+00 : f32
    %20 = vector.broadcast %cst_19 : f32 to vector<16x16xf32>
    %21 = arith.maximumf %19, %20 : vector<16x16xf32>
    %c0_20 = arith.constant 0 : index
    %c0_21 = arith.constant 0 : index
    %c0_22 = arith.constant 0 : index
    %c0_23 = arith.constant 0 : index
    %22 = vector.load %arg4[%c0_20, %c0_21, %c0_22, %c0_23] : memref<1x1x16x64xbf16, #tpu.memory_space<vmem>>, vector<1x1x16x64xbf16>
    %23 = vector.shape_cast %22 : vector<1x1x16x64xbf16> to vector<16x64xbf16>
    %c0_24 = arith.constant 0 : index
    %c0_25 = arith.constant 0 : index
    %24 = vector.load %arg5[%c0_24, %c0_25] : memref<64x16xbf16, #tpu.memory_space<vmem>>, vector<64x16xbf16>
    %cst_26 = arith.constant dense<0.000000e+00> : vector<16x16xf32>
    %25 = tpu.matmul %23, %24, %cst_26 {dimension_numbers = #tpu.dot_dimension_numbers<[1], [0], [0], [1], [0, 0, 1, 1], [], []>} : vector<16x64xbf16>, vector<64x16xbf16>, vector<16x16xf32> -> vector<16x16xf32>
    %c0_27 = arith.constant 0 : index
    %c0_28 = arith.constant 0 : index
    %26 = vector.load %arg6[%c0_27, %c0_28] : memref<1x16xf32, #tpu.memory_space<vmem>>, vector<1x16xf32>
    %27 = vector.broadcast %26 : vector<1x16xf32> to vector<16x16xf32>
    %28 = arith.addf %25, %27 : vector<16x16xf32>
    %cst_29 = arith.constant 0.000000e+00 : f32
    %29 = vector.broadcast %cst_29 : f32 to vector<16x16xf32>
    %30 = arith.maximumf %28, %29 : vector<16x16xf32>
    %c0_i32 = arith.constant 0 : i32
    %31 = arith.cmpi sgt, %arg1, %c0_i32 : i32
    %cst_30 = arith.constant 0.000000e+00 : f32
    %32 = vector.broadcast %cst_30 : f32 to vector<16x16xf32>
    %33 = arith.select %31, %21, %32 : vector<16x16xf32>
    %34 = arith.truncf %33 : vector<16x16xf32> to vector<16x16xbf16>
    %c0_31 = arith.constant 0 : index
    %c0_32 = arith.constant 0 : index
    %c0_33 = arith.constant 0 : index
    %35 = vector.load %arg12[%c0_31, %c0_32, %c0_33] : memref<10x16x16xbf16, #tpu.memory_space<vmem>>, vector<1x16x16xbf16>
    %36 = vector.shape_cast %35 : vector<1x16x16xbf16> to vector<16x16xbf16>
    %37 = vector.shape_cast %34 : vector<16x16xbf16> to vector<1x16x16xbf16>
    tpu.vector_store %arg12[%c0_31, %c0_32, %c0_33], %37 {strides = array<i32>} : memref<10x16x16xbf16, #tpu.memory_space<vmem>>, vector<1x16x16xbf16>,
    %c1_i32 = arith.constant 1 : i32
    %38 = arith.cmpi slt, %arg1, %c1_i32 : i32
    %cst_34 = arith.constant 0.000000e+00 : f32
    %39 = vector.broadcast %cst_34 : f32 to vector<16x16xf32>
    %40 = arith.select %38, %30, %39 : vector<16x16xf32>
    %41 = arith.truncf %40 : vector<16x16xf32> to vector<16x16xbf16>
    %c9 = arith.constant 9 : index
    %c0_35 = arith.constant 0 : index
    %c0_36 = arith.constant 0 : index
    %42 = vector.load %arg12[%c9, %c0_35, %c0_36] : memref<10x16x16xbf16, #tpu.memory_space<vmem>>, vector<1x16x16xbf16>
    %43 = vector.shape_cast %42 : vector<1x16x16xbf16> to vector<16x16xbf16>
    %44 = vector.shape_cast %41 : vector<16x16xbf16> to vector<1x16x16xbf16>
    tpu.vector_store %arg12[%c9, %c0_35, %c0_36], %44 {strides = array<i32>} : memref<10x16x16xbf16, #tpu.memory_space<vmem>>, vector<1x16x16xbf16>,
    %cst_37 = arith.constant 0.000000e+00 : bf16
    %45 = vector.broadcast %cst_37 : bf16 to vector<8x1x16xbf16>
    %cst_38 = arith.constant 0.000000e+00 : f32
    %46 = vector.broadcast %cst_38 : f32 to vector<128x16xf32>
    %c0_39 = arith.constant 0 : index
    %c0_40 = arith.constant 0 : index
    %c0_41 = arith.constant 0 : index
    %47 = vector.load %arg12[%c0_39, %c0_40, %c0_41] : memref<10x16x16xbf16, #tpu.memory_space<vmem>>, vector<8x16x16xbf16>
    %48 = vector.shape_cast %47 : vector<8x16x16xbf16> to vector<128x16xbf16>
    %49 = vector.extract_strided_slice %47 {offsets = [0, 0, 0], sizes = [8, 15, 16], strides = [1, 1, 1]} : vector<8x16x16xbf16> to vector<8x15x16xbf16>
    %50 = tpu.concatenate %45, %49 in 1 : vector<8x1x16xbf16>, vector<8x15x16xbf16> -> vector<8x16x16xbf16>
    %51 = vector.shape_cast %50 : vector<8x16x16xbf16> to vector<128x16xbf16>
    %52 = vector.extract_strided_slice %47 {offsets = [0, 1, 0], sizes = [8, 15, 16], strides = [1, 1, 1]} : vector<8x16x16xbf16> to vector<8x15x16xbf16>
    %53 = tpu.concatenate %52, %45 in 1 : vector<8x15x16xbf16>, vector<8x1x16xbf16> -> vector<8x16x16xbf16>
    %54 = vector.shape_cast %53 : vector<8x16x16xbf16> to vector<128x16xbf16>
    %c0_42 = arith.constant 0 : index
    %c0_43 = arith.constant 0 : index
    %c0_44 = arith.constant 0 : index
    %c0_45 = arith.constant 0 : index
    %55 = vector.load %arg7[%c0_42, %c0_43, %c0_44, %c0_45] : memref<3x3x16x16xbf16, #tpu.memory_space<vmem>>, vector<1x1x16x16xbf16>
    %56 = vector.shape_cast %55 : vector<1x1x16x16xbf16> to vector<16x16xbf16>
    %cst_46 = arith.constant dense<0.000000e+00> : vector<128x16xf32>
    %57 = tpu.matmul %51, %56, %cst_46 {dimension_numbers = #tpu.dot_dimension_numbers<[1], [0], [0], [1], [0, 0, 1, 1], [], []>} : vector<128x16xbf16>, vector<16x16xbf16>, vector<128x16xf32> -> vector<128x16xf32>
    %58 = arith.addf %46, %57 : vector<128x16xf32>
    %c0_47 = arith.constant 0 : index
    %c1_48 = arith.constant 1 : index
    %c0_49 = arith.constant 0 : index
    %c0_50 = arith.constant 0 : index
    %59 = vector.load %arg7[%c0_47, %c1_48, %c0_49, %c0_50] : memref<3x3x16x16xbf16, #tpu.memory_space<vmem>>, vector<1x1x16x16xbf16>
    %60 = vector.shape_cast %59 : vector<1x1x16x16xbf16> to vector<16x16xbf16>
    %cst_51 = arith.constant dense<0.000000e+00> : vector<128x16xf32>
    %61 = tpu.matmul %48, %60, %cst_51 {dimension_numbers = #tpu.dot_dimension_numbers<[1], [0], [0], [1], [0, 0, 1, 1], [], []>} : vector<128x16xbf16>, vector<16x16xbf16>, vector<128x16xf32> -> vector<128x16xf32>
    %62 = arith.addf %58, %61 : vector<128x16xf32>
    %c0_52 = arith.constant 0 : index
    %c2 = arith.constant 2 : index
    %c0_53 = arith.constant 0 : index
    %c0_54 = arith.constant 0 : index
    %63 = vector.load %arg7[%c0_52, %c2, %c0_53, %c0_54] : memref<3x3x16x16xbf16, #tpu.memory_space<vmem>>, vector<1x1x16x16xbf16>
    %64 = vector.shape_cast %63 : vector<1x1x16x16xbf16> to vector<16x16xbf16>
    %cst_55 = arith.constant dense<0.000000e+00> : vector<128x16xf32>
    %65 = tpu.matmul %54, %64, %cst_55 {dimension_numbers = #tpu.dot_dimension_numbers<[1], [0], [0], [1], [0, 0, 1, 1], [], []>} : vector<128x16xbf16>, vector<16x16xbf16>, vector<128x16xf32> -> vector<128x16xf32>
    %66 = arith.addf %62, %65 : vector<128x16xf32>
    %c1_56 = arith.constant 1 : index
    %c0_57 = arith.constant 0 : index
    %c0_58 = arith.constant 0 : index
    %67 = vector.load %arg12[%c1_56, %c0_57, %c0_58] : memref<10x16x16xbf16, #tpu.memory_space<vmem>>, vector<8x16x16xbf16>
    %68 = vector.shape_cast %67 : vector<8x16x16xbf16> to vector<128x16xbf16>
    %69 = vector.extract_strided_slice %67 {offsets = [0, 0, 0], sizes = [8, 15, 16], strides = [1, 1, 1]} : vector<8x16x16xbf16> to vector<8x15x16xbf16>
    %70 = tpu.concatenate %45, %69 in 1 : vector<8x1x16xbf16>, vector<8x15x16xbf16> -> vector<8x16x16xbf16>
    %71 = vector.shape_cast %70 : vector<8x16x16xbf16> to vector<128x16xbf16>
    %72 = vector.extract_strided_slice %67 {offsets = [0, 1, 0], sizes = [8, 15, 16], strides = [1, 1, 1]} : vector<8x16x16xbf16> to vector<8x15x16xbf16>
    %73 = tpu.concatenate %72, %45 in 1 : vector<8x15x16xbf16>, vector<8x1x16xbf16> -> vector<8x16x16xbf16>
    %74 = vector.shape_cast %73 : vector<8x16x16xbf16> to vector<128x16xbf16>
    %c1_59 = arith.constant 1 : index
    %c0_60 = arith.constant 0 : index
    %c0_61 = arith.constant 0 : index
    %c0_62 = arith.constant 0 : index
    %75 = vector.load %arg7[%c1_59, %c0_60, %c0_61, %c0_62] : memref<3x3x16x16xbf16, #tpu.memory_space<vmem>>, vector<1x1x16x16xbf16>
    %76 = vector.shape_cast %75 : vector<1x1x16x16xbf16> to vector<16x16xbf16>
    %cst_63 = arith.constant dense<0.000000e+00> : vector<128x16xf32>
    %77 = tpu.matmul %71, %76, %cst_63 {dimension_numbers = #tpu.dot_dimension_numbers<[1], [0], [0], [1], [0, 0, 1, 1], [], []>} : vector<128x16xbf16>, vector<16x16xbf16>, vector<128x16xf32> -> vector<128x16xf32>
    %78 = arith.addf %66, %77 : vector<128x16xf32>
    %c1_64 = arith.constant 1 : index
    %c1_65 = arith.constant 1 : index
    %c0_66 = arith.constant 0 : index
    %c0_67 = arith.constant 0 : index
    %79 = vector.load %arg7[%c1_64, %c1_65, %c0_66, %c0_67] : memref<3x3x16x16xbf16, #tpu.memory_space<vmem>>, vector<1x1x16x16xbf16>
    %80 = vector.shape_cast %79 : vector<1x1x16x16xbf16> to vector<16x16xbf16>
    %cst_68 = arith.constant dense<0.000000e+00> : vector<128x16xf32>
    %81 = tpu.matmul %68, %80, %cst_68 {dimension_numbers = #tpu.dot_dimension_numbers<[1], [0], [0], [1], [0, 0, 1, 1], [], []>} : vector<128x16xbf16>, vector<16x16xbf16>, vector<128x16xf32> -> vector<128x16xf32>
    %82 = arith.addf %78, %81 : vector<128x16xf32>
    %c1_69 = arith.constant 1 : index
    %c2_70 = arith.constant 2 : index
    %c0_71 = arith.constant 0 : index
    %c0_72 = arith.constant 0 : index
    %83 = vector.load %arg7[%c1_69, %c2_70, %c0_71, %c0_72] : memref<3x3x16x16xbf16, #tpu.memory_space<vmem>>, vector<1x1x16x16xbf16>
    %84 = vector.shape_cast %83 : vector<1x1x16x16xbf16> to vector<16x16xbf16>
    %cst_73 = arith.constant dense<0.000000e+00> : vector<128x16xf32>
    %85 = tpu.matmul %74, %84, %cst_73 {dimension_numbers = #tpu.dot_dimension_numbers<[1], [0], [0], [1], [0, 0, 1, 1], [], []>} : vector<128x16xbf16>, vector<16x16xbf16>, vector<128x16xf32> -> vector<128x16xf32>
    %86 = arith.addf %82, %85 : vector<128x16xf32>
    %c2_74 = arith.constant 2 : index
    %c0_75 = arith.constant 0 : index
    %c0_76 = arith.constant 0 : index
    %87 = vector.load %arg12[%c2_74, %c0_75, %c0_76] : memref<10x16x16xbf16, #tpu.memory_space<vmem>>, vector<8x16x16xbf16>
    %88 = vector.shape_cast %87 : vector<8x16x16xbf16> to vector<128x16xbf16>
    %89 = vector.extract_strided_slice %87 {offsets = [0, 0, 0], sizes = [8, 15, 16], strides = [1, 1, 1]} : vector<8x16x16xbf16> to vector<8x15x16xbf16>
    %90 = tpu.concatenate %45, %89 in 1 : vector<8x1x16xbf16>, vector<8x15x16xbf16> -> vector<8x16x16xbf16>
    %91 = vector.shape_cast %90 : vector<8x16x16xbf16> to vector<128x16xbf16>
    %92 = vector.extract_strided_slice %87 {offsets = [0, 1, 0], sizes = [8, 15, 16], strides = [1, 1, 1]} : vector<8x16x16xbf16> to vector<8x15x16xbf16>
    %93 = tpu.concatenate %92, %45 in 1 : vector<8x15x16xbf16>, vector<8x1x16xbf16> -> vector<8x16x16xbf16>
    %94 = vector.shape_cast %93 : vector<8x16x16xbf16> to vector<128x16xbf16>
    %c2_77 = arith.constant 2 : index
    %c0_78 = arith.constant 0 : index
    %c0_79 = arith.constant 0 : index
    %c0_80 = arith.constant 0 : index
    %95 = vector.load %arg7[%c2_77, %c0_78, %c0_79, %c0_80] : memref<3x3x16x16xbf16, #tpu.memory_space<vmem>>, vector<1x1x16x16xbf16>
    %96 = vector.shape_cast %95 : vector<1x1x16x16xbf16> to vector<16x16xbf16>
    %cst_81 = arith.constant dense<0.000000e+00> : vector<128x16xf32>
    %97 = tpu.matmul %91, %96, %cst_81 {dimension_numbers = #tpu.dot_dimension_numbers<[1], [0], [0], [1], [0, 0, 1, 1], [], []>} : vector<128x16xbf16>, vector<16x16xbf16>, vector<128x16xf32> -> vector<128x16xf32>
    %98 = arith.addf %86, %97 : vector<128x16xf32>
    %c2_82 = arith.constant 2 : index
    %c1_83 = arith.constant 1 : index
    %c0_84 = arith.constant 0 : index
    %c0_85 = arith.constant 0 : index
    %99 = vector.load %arg7[%c2_82, %c1_83, %c0_84, %c0_85] : memref<3x3x16x16xbf16, #tpu.memory_space<vmem>>, vector<1x1x16x16xbf16>
    %100 = vector.shape_cast %99 : vector<1x1x16x16xbf16> to vector<16x16xbf16>
    %cst_86 = arith.constant dense<0.000000e+00> : vector<128x16xf32>
    %101 = tpu.matmul %88, %100, %cst_86 {dimension_numbers = #tpu.dot_dimension_numbers<[1], [0], [0], [1], [0, 0, 1, 1], [], []>} : vector<128x16xbf16>, vector<16x16xbf16>, vector<128x16xf32> -> vector<128x16xf32>
    %102 = arith.addf %98, %101 : vector<128x16xf32>
    %c2_87 = arith.constant 2 : index
    %c2_88 = arith.constant 2 : index
    %c0_89 = arith.constant 0 : index
    %c0_90 = arith.constant 0 : index
    %103 = vector.load %arg7[%c2_87, %c2_88, %c0_89, %c0_90] : memref<3x3x16x16xbf16, #tpu.memory_space<vmem>>, vector<1x1x16x16xbf16>
    %104 = vector.shape_cast %103 : vector<1x1x16x16xbf16> to vector<16x16xbf16>
    %cst_91 = arith.constant dense<0.000000e+00> : vector<128x16xf32>
    %105 = tpu.matmul %94, %104, %cst_91 {dimension_numbers = #tpu.dot_dimension_numbers<[1], [0], [0], [1], [0, 0, 1, 1], [], []>} : vector<128x16xbf16>, vector<16x16xbf16>, vector<128x16xf32> -> vector<128x16xf32>
    %106 = arith.addf %102, %105 : vector<128x16xf32>
    %c0_92 = arith.constant 0 : index
    %c0_93 = arith.constant 0 : index
    %107 = vector.load %arg8[%c0_92, %c0_93] : memref<1x16xf32, #tpu.memory_space<vmem>>, vector<1x16xf32>
    %108 = vector.broadcast %107 : vector<1x16xf32> to vector<128x16xf32>
    %109 = arith.addf %106, %108 : vector<128x16xf32>
    %cst_94 = arith.constant 0.000000e+00 : f32
    %110 = vector.broadcast %cst_94 : f32 to vector<128x16xf32>
    %111 = arith.maximumf %109, %110 : vector<128x16xf32>
    %112 = arith.truncf %111 : vector<128x16xf32> to vector<128x16xbf16>
    %c0_95 = arith.constant 0 : index
    %c0_96 = arith.constant 0 : index
    %113 = vector.load %arg9[%c0_95, %c0_96] : memref<16x64xbf16, #tpu.memory_space<vmem>>, vector<16x64xbf16>
    %cst_97 = arith.constant dense<0.000000e+00> : vector<128x64xf32>
    %114 = tpu.matmul %112, %113, %cst_97 {dimension_numbers = #tpu.dot_dimension_numbers<[1], [0], [0], [1], [0, 0, 1, 1], [], []>} : vector<128x16xbf16>, vector<16x64xbf16>, vector<128x64xf32> -> vector<128x64xf32>
    %c0_98 = arith.constant 0 : index
    %c0_99 = arith.constant 0 : index
    %115 = vector.load %arg10[%c0_98, %c0_99] : memref<1x64xf32, #tpu.memory_space<vmem>>, vector<1x64xf32>
    %116 = vector.broadcast %115 : vector<1x64xf32> to vector<128x64xf32>
    %117 = arith.addf %114, %116 : vector<128x64xf32>
    %c0_100 = arith.constant 0 : index
    %c0_101 = arith.constant 0 : index
    %c0_102 = arith.constant 0 : index
    %c0_103 = arith.constant 0 : index
    %118 = vector.load %arg2[%c0_100, %c0_101, %c0_102, %c0_103] : memref<1x8x16x64xbf16, #tpu.memory_space<vmem>>, vector<1x8x16x64xbf16>
    %119 = vector.shape_cast %118 : vector<1x8x16x64xbf16> to vector<8x16x64xbf16>
    %120 = vector.shape_cast %119 : vector<8x16x64xbf16> to vector<128x64xbf16>
    %121 = arith.extf %120 : vector<128x64xbf16> to vector<128x64xf32>
    %122 = arith.addf %117, %121 : vector<128x64xf32>
    %cst_104 = arith.constant 0.000000e+00 : f32
    %123 = vector.broadcast %cst_104 : f32 to vector<128x64xf32>
    %124 = arith.maximumf %122, %123 : vector<128x64xf32>
    %125 = vector.shape_cast %124 : vector<128x64xf32> to vector<8x16x64xf32>
    %126 = arith.truncf %125 : vector<8x16x64xf32> to vector<8x16x64xbf16>
    %c0_105 = arith.constant 0 : index
    %c0_106 = arith.constant 0 : index
    %c0_107 = arith.constant 0 : index
    %c0_108 = arith.constant 0 : index
    %127 = vector.load %arg11[%c0_105, %c0_106, %c0_107, %c0_108] : memref<1x8x16x64xbf16, #tpu.memory_space<vmem>>, vector<1x8x16x64xbf16>
    %128 = vector.shape_cast %127 : vector<1x8x16x64xbf16> to vector<8x16x64xbf16>
    %129 = vector.shape_cast %126 : vector<8x16x64xbf16> to vector<1x8x16x64xbf16>
    tpu.vector_store %arg11[%c0_105, %c0_106, %c0_107, %c0_108], %129 {strides = array<i32>} : memref<1x8x16x64xbf16, #tpu.memory_space<vmem>>, vector<1x8x16x64xbf16>,
    return
  }
  func.func @transform_0(%arg0: i32, %arg1: i32) -> (i32, i32, i32, i32) {
    %c0_i32 = arith.constant 0 : i32
    %c0_i32_0 = arith.constant 0 : i32
    %c0_i32_1 = arith.constant 0 : i32
    return %arg0, %arg1, %c0_i32, %c0_i32_0 : i32, i32, i32, i32
  }
  func.func @transform_1(%arg0: i32, %arg1: i32) -> (i32, i32, i32, i32) {
    %c8_i32 = arith.constant 8 : i32
    %0 = arith.muli %arg1, %c8_i32 : i32
    %c1_i32 = arith.constant 1 : i32
    %1 = arith.subi %0, %c1_i32 : i32
    %c0_i32 = arith.constant 0 : i32
    %2 = arith.maxsi %1, %c0_i32 : i32
    %c0_i32_0 = arith.constant 0 : i32
    %c0_i32_1 = arith.constant 0 : i32
    %c0_i32_2 = arith.constant 0 : i32
    return %arg0, %2, %c0_i32_0, %c0_i32_1 : i32, i32, i32, i32
  }
  func.func @transform_2(%arg0: i32, %arg1: i32) -> (i32, i32, i32, i32) {
    %c1_i32 = arith.constant 1 : i32
    %0 = arith.addi %arg1, %c1_i32 : i32
    %c8_i32 = arith.constant 8 : i32
    %1 = arith.muli %0, %c8_i32 : i32
    %c15_i32 = arith.constant 15 : i32
    %2 = arith.minsi %1, %c15_i32 : i32
    %c0_i32 = arith.constant 0 : i32
    %c0_i32_0 = arith.constant 0 : i32
    %c0_i32_1 = arith.constant 0 : i32
    return %arg0, %2, %c0_i32, %c0_i32_0 : i32, i32, i32, i32
  }
  func.func @transform_3(%arg0: i32, %arg1: i32) -> (i32, i32) {
    %c0_i32 = arith.constant 0 : i32
    %c0_i32_0 = arith.constant 0 : i32
    %c0_i32_1 = arith.constant 0 : i32
    return %c0_i32, %c0_i32_0 : i32, i32
  }
  func.func @transform_4(%arg0: i32, %arg1: i32) -> (i32, i32) {
    %c0_i32 = arith.constant 0 : i32
    %c0_i32_0 = arith.constant 0 : i32
    %c0_i32_1 = arith.constant 0 : i32
    return %c0_i32, %c0_i32_0 : i32, i32
  }
  func.func @transform_5(%arg0: i32, %arg1: i32) -> (i32, i32, i32, i32) {
    %c0_i32 = arith.constant 0 : i32
    %c0_i32_0 = arith.constant 0 : i32
    %c0_i32_1 = arith.constant 0 : i32
    %c0_i32_2 = arith.constant 0 : i32
    %c0_i32_3 = arith.constant 0 : i32
    return %c0_i32, %c0_i32_0, %c0_i32_1, %c0_i32_2 : i32, i32, i32, i32
  }
  func.func @transform_6(%arg0: i32, %arg1: i32) -> (i32, i32) {
    %c0_i32 = arith.constant 0 : i32
    %c0_i32_0 = arith.constant 0 : i32
    %c0_i32_1 = arith.constant 0 : i32
    return %c0_i32, %c0_i32_0 : i32, i32
  }
  func.func @transform_7(%arg0: i32, %arg1: i32) -> (i32, i32) {
    %c0_i32 = arith.constant 0 : i32
    %c0_i32_0 = arith.constant 0 : i32
    %c0_i32_1 = arith.constant 0 : i32
    return %c0_i32, %c0_i32_0 : i32, i32
  }
  func.func @transform_8(%arg0: i32, %arg1: i32) -> (i32, i32) {
    %c0_i32 = arith.constant 0 : i32
    %c0_i32_0 = arith.constant 0 : i32
    %c0_i32_1 = arith.constant 0 : i32
    return %c0_i32, %c0_i32_0 : i32, i32
  }
  func.func @transform_9(%arg0: i32, %arg1: i32) -> (i32, i32, i32, i32) {
    %c0_i32 = arith.constant 0 : i32
    %c0_i32_0 = arith.constant 0 : i32
    %c0_i32_1 = arith.constant 0 : i32
    return %arg0, %arg1, %c0_i32, %c0_i32_0 : i32, i32, i32, i32
  }
}

</mosaic_0001>

<bundles_post_ra>
// kernel: tpu_custom_call.1
= control target key start
LH: loop header
LB: loop body
LE: loop exit
PB: predicated region body
PF: predicated region fallthrough
CT: control target
= control target key end

     0   :  { %s4557_s0 = inlined_call_operand.hbm [shape: bf16[2,16,16,64], index: 0, kind: input, shape index: {}]   ;;  %s4558_s1 = inlined_call_operand.hbm [shape: bf16[2,16,16,64], index: 1, kind: input, shape index: {}]   ;;  %s4559_s2 = inlined_call_operand.hbm [shape: bf16[2,16,16,64], index: 2, kind: input, shape index: {}]   ;;  %s4560_s3 = inlined_call_operand.vmem [shape: bf16[64,16], index: 3, kind: input, shape index: {}]   ;;  %s4561_s4 = inlined_call_operand.vmem [shape: f32[1,16], index: 4, kind: input, shape index: {}]   ;;  %s4562_s5 = inlined_call_operand.hbm [shape: bf16[3,3,16,16], index: 5, kind: input, shape index: {}]   ;;  %s4563_s6 = inlined_call_operand.vmem [shape: f32[1,16], index: 6, kind: input, shape index: {}]   ;;  %s4564_s7 = inlined_call_operand.vmem [shape: bf16[16,64], index: 7, kind: input, shape index: {}]   ;;  %s4565_s8 = inlined_call_operand.vmem [shape: f32[1,64], index: 8, kind: input, shape index: {}]   ;;  %s4566_s9 = inlined_call_operand.hbm [shape: bf16[2,16,16,64], index: 9, kind: output, shape index: {}]  }
   0x1   :  { %4587 = sst [smem:[#allocation31_spill]] %s4557_s0 }
   0x2   :  { %4588 = sst [smem:[#allocation32_spill]] %s4558_s1 }
   0x3   :  { %4589 = sst [smem:[#allocation33_spill]] %s4559_s2 }
   0x4   :  { %4590 = sst [smem:[#allocation34_spill]] %s4560_s3 }
   0x5   :  { %4591 = sst [smem:[#allocation35_spill]] %s4561_s4 }
   0x6   :  { %4592 = sst [smem:[#allocation36_spill]] %s4562_s5 }
   0x7   :  { %4593 = sst [smem:[#allocation37_spill]] %s4563_s6 }
   0x8   :  { %4594 = sst [smem:[#allocation38_spill]] %s4564_s7 }
   0x9   :  { %4595 = sst [smem:[#allocation39_spill]] %s4565_s8 }
   0xa   :  { %4596 = sst [smem:[#allocation40_spill]] %s4566_s9 }
   0xb   :  { %14 = vsyncpa [#allocation4], 0 }
   0xc   :  { %16 = vsyncpa [#allocation4 + $0x1], 0 }
   0xd   :  { %17 = vsyncpa [#allocation7], 0 }
   0xe   :  { %19 = vsyncpa [#allocation7 + $0x1], 0 }
   0xf   :  { %20 = vsyncpa [#allocation10], 0 }
  0x10   :  { %21 = vsyncpa [#allocation5], 0 }
  0x11   :  { %23 = vsyncpa [#allocation5 + $0x1], 0  ;;  %s3477_s30 = smov 0   ;;  %s3479_s10 = smov 0  }
  0x12   :  { %s3481_s11 = smov 0   ;;  %s3483_s12 = smov 0  }
  0x13   :  { %s3485_s13 = smov 0   ;;  %s3487_s14 = smov 0  }
  0x14   :  { %s3489_s15 = smov 0   ;;  %s3491_s16 = smov 0  }
  0x15   :  { %s3493_s17 = smov 0   ;;  %s3495_s18 = smov 0  }
  0x16   :  { %s3497_s19 = smov 0   ;;  %s3499_s20 = smov 0  }
  0x17   :  { %s3501_s21 = smov 0   ;;  %s3503_s22 = smov 0  }
  0x18 LB: > { %4597 = sst [smem:[#allocation17_spill]] %s3388_s14  ;;  %s38_s23 = sadd.s32 1, %s3412_s20  ;;  %s3420_s22 = sphi %s3503_s22, %s29_s22   ;;  %s3416_s21 = sphi %s3501_s21, %s4659_s21   ;;  %s3412_s20 = sphi %s3499_s20, %s4658_s20   ;;  %s3408_s19 = sphi %s3497_s19, %s4657_s19   ;;  %s3404_s18 = sphi %s3495_s18, %s4656_s18   ;;  %s3400_s17 = sphi %s3493_s17, %s4655_s17   ;;  %s3396_s16 = sphi %s3491_s16, %s4666_s16   ;;  %s3392_s15 = sphi %s3489_s15, %s4665_s15   ;;  %s3388_s14 = sphi %s3487_s14, %s4653_s14   ;;  %s3384_s13 = sphi %s3485_s13, %s4664_s13   ;;  %s3380_s12 = sphi %s3483_s12, %s4663_s12   ;;  %s3376_s11 = sphi %s3481_s11, %s4662_s11   ;;  %s3372_s10 = sphi %s3479_s10, %s4661_s10   ;;  %s3368_s30 = sphi %s3477_s30, %s4660_s30  }
  0x19   : > { %4598 = sst [smem:[#allocation18_spill]] %s3392_s15  ;;  %s41_s24 = sadd.s32 1, %s3416_s21 }
  0x1a   : > { %4599 = sst [smem:[#allocation19_spill]] %s3400_s17  ;;  %p39_p0 = scmp.ge.s32.totalorder %s38_s23, 2 }
  0x1b   : > { %4600 = sst [smem:[#allocation20_spill]] %s3404_s18  ;;  %p58_p1 = scmp.eq.s32.totalorder %s3420_s22, 0 }
  0x1c   : > { %4601 = sst [smem:[#allocation21_spill]] %s3408_s19  ;;  %s2547_s25 = sshll.u32 %s3412_s20, 3 }
  0x1d   : > { %4602 = sst [smem:[#allocation22_spill]] %s3412_s20  ;;  %s86_s26 = sadd.s32 1, %s3388_s14 }
  0x1e   : > { %4603 = sst [smem:[#allocation23_spill]] %s3416_s21  ;;  %s4668_s23 = smov (%p39_p0, %s38_s23), 0 }
  0x1f   : > { %4604 = sst [smem:[#allocation24_spill]] %s4668_s23  ;;  %s4670_s24 = smov (!%p39_p0, %s41_s24), %s3416_s21 }
  0x20   : > { %s46_s27 = ssub.s32 %s3412_s20, %s4668_s23  ;;  %s2548_s28 = sadd.s32 4294967295, %s2547_s25 }
  0x21   : > { %p43_p2 = scmp.ge.s32.totalorder %s4670_s24, 2  ;;  %p75_p3 = scmp.gt.s32.totalorder %s2548_s28, 0 }
  0x22   : > { %s2549_s29 = sshll.u32 %s4668_s23, 3  ;;  %p93_p4 = scmp.ne.s32.totalorder %s3388_s14, %s3384_s13 }
  0x23   : > { %s4672_s24 = smov (%p43_p2, %s4670_s24), 0  ;;  %s4674_s28 = smov (!%p75_p3, %s2548_s28), 0 }
  0x24   : > { %4605 = sst [smem:[#allocation25_spill]] %s4672_s24  ;;  %s3564_s9 = ssub.s32 %s3416_s21, %s4672_s24 }
  0x25   : > { %4606 = sst [smem:[#allocation26_spill]] %s3564_s9  ;;  %s2550_s19 = sadd.s32 4294967295, %s2549_s29 }
  0x26   : > { %s3567_s8 = sor.u32 %s46_s27, %s3564_s9  ;;  %p79_p5 = scmp.gt.s32.totalorder %s2550_s19, 0 }
  0x27   : > { %p48_p6 = scmp.eq.s32.totalorder %s3567_s8, 0  ;;  %p3572_p7 = por %p93_p4, %p58_p1 }
  0x28   : > { %s4676_s19 = smov (!%p79_p5, %s2550_s19), 0  ;;  %p99_p8 = scmp.ne.s32.totalorder %s3384_s13, %s3380_s12 }
  0x29   : > { %s3578_s24 = sadd.s32 8, %s2547_s25  ;;  %s82_s6 = ssub.s32 %s4674_s28, %s4676_s19 }
  0x2a   : > { %p111_p9 = scmp.lt.s32.totalorder %s3578_s24, 15  ;;  %s83_s7 = sor.u32 %s82_s6, %s3564_s9 }
  0x2b   : > { %s3582_s27 = sadd.s32 8, %s2549_s29  ;;  %p84_p10 = scmp.eq.s32.totalorder %s83_s7, 0 }
  0x2c   : > { %p4583_p12 = scmp.lt.s32.totalorder %s3420_s22, 4  ;;  %s3590_s18 = sshll.u32 %s3416_s21, 5 }
  0x2d   : > { %s3586_s4 = scalar_select %p84_p10, %s3388_s14, %s86_s26  }
  0x2e   : > { %s367_s3 = sand.u32 1, %s3420_s22   ;;  %s369_s25 = sand.u32 1, %s3388_s14  }
  0x2f   : > { %4608 = sst [smem:[#allocation27_spill]] %s3586_s4  ;;  %s2561_s2 = sshll.u32 %s369_s25, 3 }
  0x30   : > { %s2564_s19 = sshll.u32 %s4674_s28, 1  ;;  %s371_s0 = scalar_lea.vmem [#allocation6], %s2561_s2 }
  0x31   : > { %s380_s6 = sadd.s32 %s2564_s19, %s3590_s18  ;;  %s385_s7 = sshll.u32 %s371_s0, 4  ;;  %s386_s7 = int_to_ptr.vmem [resolvable:$true] %s385_s7 }
  0x32   : > { %s2566_s29 = sshll.u32 %s380_s6, 2  ;;  %s4609_s1 = sld [smem:[#allocation32_spill]] }
  0x33   : > { %p3007_p13 = pnand %p4583_p12, %p3572_p7  ;;  %s3602_s25 = scalar_lea.sflag [#allocation7], %s367_s3 }
  0x34   : > { %s4575_s28 = smov 64   ;;  %s4577_s19 = smov 4  }
  0x35   : > { %s3609_s0 = sadd.s32 4294967295, %s3420_s22   ;;  %p2553_p0 = scmp.ge.s32.totalorder %s3420_s22, 1 }
  0x36   : > { %p64_p2 = scmp.eq.s32.totalorder %s3609_s0, 0  ;;  %p300_p3 = scmp.lt.s32.totalorder %s3420_s22, 5 }
  0x37   : > { %s4610_s5 = sld [smem:[#allocation36_spill]]  ;;  %s3424_s23 = smov [#allocation9]  }
  0x38   : > { %s382_s4 = scalar_lea.hbm %s4609_s1, %s2566_s29  ;;  %p3622_p4 = por %p99_p8, %p64_p2 }
  0x39   : > { %s383_s21 = sshll.u32 %s382_s4, 4  ;;  %p3626_p5 = pnand %p2553_p0, %p300_p3  ;;  %s384_s21 = int_to_ptr.hbm [resolvable:$true] %s383_s21 }
  0x3a   : > { %3009 = dma.hbm_to_vmem [thread:$0]  (!%p3007_p13), %s384_s21, 128, %s386_s7, %s3602_s25, %s4575_s28, %s4575_s28, %s4577_s19  }
  0x3b   : > { %p2999_p7 = pneg %p3626_p5  ;;  %s319_s6 = sshll.u32 %s3424_s23, 4  ;;  %s320_s6 = int_to_ptr.vmem [resolvable:$true] %s319_s6 }
  0x3c   : > { %s2546_s12 = sadd.s32 4294967294, %s3420_s22   ;;  %s50_s29 = sadd.s32 1, %s3400_s17 }
  0x3d   : > { %s317_s4 = sshll.u32 %s4610_s5, 4  ;;  %p3000_p10 = pnand %p2999_p7, %p64_p2  ;;  %s318_s4 = int_to_ptr.hbm [resolvable:$true] %s317_s4 }
  0x3e   : > { %p57_p8 = scmp.ne.s32.totalorder %s3400_s17, %s3396_s16  ;;  %p63_p0 = scmp.ne.s32.totalorder %s3396_s16, %s3392_s15 }
  0x3f   : > { %3002 = dma.hbm_to_vmem [thread:$0]  (!%p3000_p10), %s318_s4, 1152, %s320_s6, [#allocation10], %s4575_s28, %s4575_s28, %s4577_s19  }
  0x40   : > { %s3644_s7 = scalar_select %p48_p6, %s3400_s17, %s50_s29  }
  0x41   : > { %p3648_p13 = por %p58_p1, %p57_p8  ;;  %p287_p3 = scmp.eq.s32.totalorder %s3609_s0, 3 }
  0x42   : > { %4613 = sst [smem:[#allocation28_spill]] %s3644_s7  ;;  %p293_p7 = scmp.eq.s32.totalorder %s2546_s12, 3 }
  0x43   : > { %p3657_p11 = por %p64_p2, %p63_p0  ;;  %s342_s3 = sand.u32 1, %s3400_s17  }
  0x44   : > { %p3662_p10 = por %p287_p3, %p57_p8  ;;  %p3666_p6 = por %p293_p7, %p63_p0 }
  0x45   : > { %s2556_s23 = sshll.u32 %s342_s3, 6  ;;  %s2887_s6 = sshll.u32 %s3412_s20, 4 }
  0x46   : > { %s4616_s8 = scalar_select %p3662_p10, 1, 0 }
  0x47   : > { %s4618_s4 = scalar_select %p3666_p6, 1, 0 }
  0x48   : > { %4617 = sst [smem:[#allocation29_spill]] %s4616_s8  ;;  %s352_s12 = sadd.s32 %s2887_s6, %s3590_s18 }
  0x49   : > { %4619 = sst [smem:[#allocation30_spill]] %s4618_s4  ;;  %s346_s29 = scalar_lea.vmem [#allocation3], %s2556_s23 }
  0x4a   : > { %s357_s28 = sshll.u32 %s346_s29, 4  ;;  %s4620_s19 = sld [smem:[#allocation26_spill]]  ;;  %s358_s28 = int_to_ptr.vmem [resolvable:$true] %s357_s28 }
  0x4b   : > { %s2560_s1 = sshll.u32 %s352_s12, 2  ;;  %s4621_s17 = sld [smem:[#allocation31_spill]] }
  0x4c   : > { %p3004_p8 = pnand %p4583_p12, %p3648_p13  ;;  %s343_s20 = scalar_lea.sflag [#allocation4], %s342_s3 }
  0x4d   : > { %s4622_s6 = smov 4   ;;  %s4623_s23 = smov 64  }
  0x4e   : > { %s122_s12 = sadd.s32 1, %s3376_s11  ;;  %s4678_s24 = smov (!%p111_p9, %s3578_s24), 15 }
  0x4f   : > { %p4624_p0 = scmp.lt.s32.totalorder %s3582_s27, 15  ;;  %p129_p3 = scmp.ne.s32.totalorder %s3376_s11, %s3372_s10 }
  0x50   : > { %p135_p7 = scmp.ne.s32.totalorder %s3372_s10, %s3368_s30  ;;  %s397_s5 = sand.u32 1, %s3376_s11  }
  0x51   : > { %s354_s14 = scalar_lea.hbm %s4621_s17, %s2560_s1  ;;  %s4680_s27 = smov (!%p4624_p0, %s3582_s27), 15 }
  0x52   : > { %s355_s4 = sshll.u32 %s354_s14, 4  ;;  %s118_s1 = ssub.s32 %s4678_s24, %s4680_s27  ;;  %s356_s4 = int_to_ptr.hbm [resolvable:$true] %s355_s4 }
  0x53   : > { %3006 = dma.hbm_to_vmem [thread:$0]  (!%p3004_p8), %s356_s4, 1024, %s358_s28, %s343_s20, %s4623_s23, %s4623_s23, %s4622_s6  }
  0x54   : > { %s119_s17 = sor.u32 %s118_s1, %s4620_s19  ;;  %p3697_p13 = por %p129_p3, %p58_p1 }
  0x55   : > { %p120_p12 = scmp.eq.s32.totalorder %s119_s17, 0  ;;  %p3703_p8 = por %p135_p7, %p64_p2 }
  0x56   : > { %s2567_s28 = sshll.u32 %s397_s5, 3  ;;  %s2569_s7 = sshll.u32 %s4678_s24, 1 }
  0x57   : > { %s3708_s30 = scalar_select %p120_p12, %s3376_s11, %s122_s12  }
  0x58   : > { %s408_s27 = sadd.s32 %s2569_s7, %s3590_s18  ;;  %s399_s19 = scalar_lea.vmem [#allocation8], %s2567_s28 }
  0x59   : > { %s2571_s26 = sshll.u32 %s408_s27, 2  ;;  %s413_s3 = sshll.u32 %s399_s19, 4  ;;  %s414_s3 = int_to_ptr.vmem [resolvable:$true] %s413_s3 }
  0x5a   : > { %s4627_s1 = sld [smem:[#allocation33_spill]]  ;;  %p4628_p1 = scmp.lt.s32.totalorder %s3420_s22, 4 }
  0x5b   : > { %s3725_s18 = sand.u32 (!%p3626_p5), 1, %s3396_s16  }
  0x5c   : > { %p3010_p9 = pnand %p4628_p1, %p3697_p13  ;;  %s2573_s24 = sshll.u32 (!%p3626_p5), %s3725_s18, 6 }
  0x5d   : > { %s3731_s12 = scalar_lea.vmem (!%p3626_p5), [#allocation3], %s2573_s24 }
  0x5e   : > { %425 = sbr.rel (%p3626_p5) target bundleno = 946 (0x3b2), region = 56 }
  0x60   : > { %s410_s15 = scalar_lea.hbm %s4627_s1, %s2571_s26 }
  0x61   : > { %s411_s8 = sshll.u32 %s410_s15, 4  ;;  %s428_s15 = scalar_lea.sflag (!%p3626_p5), [#allocation4], %s3725_s18  ;;  %s412_s8 = int_to_ptr.hbm [resolvable:$true] %s411_s8 }
  0x62   : > { %3012 = dma.hbm_to_vmem [thread:$0]  (!%p3010_p9), %s412_s8, 128, %s414_s3, %s3602_s25, %s4623_s23, %s4623_s23, %s4622_s6  }
  0x63   : > { %3347 = dma.done.wait (%p3657_p11), %s428_s15, 1024  }
  0x64   : > { %3349 = vsyncadd (%p3657_p11), %s428_s15, 4294966272  ;;  %s437_s25 = sand.u32 1, %s3609_s0   ;;  %s439_s21 = sand.u32 1, %s3384_s13  }
  0x65   : > { %s3739_s8 = sshll.u32 %s439_s21, 3  ;;  %s438_s6 = scalar_lea.sflag [#allocation7], %s437_s25 }
  0x66   : > { %s441_s23 = scalar_lea.vmem [#allocation6], %s3739_s8 }
  0x67   : > { %3351 = dma.done.wait (%p3622_p4), %s438_s6, 128  }
  0x68   : > { %3353 = vsyncadd (%p3622_p4), %s438_s6, 4294967168  ;;  %s449_s5 = sand.u32 1, %s3372_s10  }
  0x69   : > { %s3747_s2 = sshll.u32 %s449_s5, 3 }
  0x6a   : > { %s451_s17 = scalar_lea.vmem [#allocation8], %s3747_s2 }
  0x6b   : > { %3355 = dma.done.wait (%p3703_p8), %s438_s6, 128  }
  0x6c   : > { %3357 = vsyncadd (%p3703_p8), %s438_s6, 4294967168 }
  0x6d   : > { %3359 = dma.done.wait (%p64_p2), [#allocation10], 1152  }
  0x6e   : > { %3361 = vsyncadd (%p64_p2), [#allocation10], 4294966144  ;;  %s4629_s28 = sld [smem:[#allocation34_spill]]  ;;  %v2890_v8 = vld [vmem:[%s3731_s12] sm:$0xff]  ;;  %vm605_vm0 = vcmask 523264   ;;  %v2891_v10 = vld [vmem:[%s3731_s12 + $0x8] sm:$0xff] }
  0x6f   : > { %v2902_v9 = vld [vmem:[%s441_s23] sm:$0xff]  ;;  %v2892_v11 = vld [vmem:[%s3731_s12 + $0x10] sm:$0xff]  ;;  %s4630_s6 = sld [smem:[#allocation20_spill]]  ;;  %v2893_v12 = vld [vmem:[%s3731_s12 + $0x18] sm:$0xff]  ;;  %vm712_vm2 = vcmask 125952   ;;  %vm1015_vm3 = vcmask 130048  }
  0x70   : > { %v2894_v13 = vld [vmem:[%s3731_s12 + $0x20] sm:$0xff]  ;;  %v2897_v14 = vld [vmem:[%s3731_s12 + $0x38] sm:$0xff]  ;;  %v2895_v15 = vld [vmem:[%s3731_s12 + $0x28] sm:$0xff]  ;;  %s4631_s14 = sld [smem:[#allocation35_spill]]  ;;  %vm958_vm4 = vcmask 1040384   ;;  %vm993_vm7 = vcmask 1047552  }
  0x71   : > { %v2896_v16 = vld [vmem:[%s3731_s12 + $0x30] sm:$0xff]  ;;  %v2928_v17 = vld [vmem:[#allocation9 + $0x20] sm:$0xff]  ;;  %v2917_v18 = vld [vmem:[#allocation9 + $0x8] sm:$0xff]  ;;  %vm959_vm5 = vsmask.f32 256  ;;  %s4641_s19 = sld [smem:[#allocation38_spill]] }
  0x72   : > { %1039 = vmatpush.bf16.msra.mxu3 %v2917_v18  ;;  %v2916_v19 = vld [vmem:[#allocation9] sm:$0xff]  ;;  %v2927_v23 = vld [vmem:[#allocation9 + $0x18] sm:$0xff]  ;;  %vm3834_vm6 = vmand %vm958_vm4, %vm959_vm5  ;;  %vm994_vm8 = vsmask.f32 7424  ;;  %s4642_s4 = sld [smem:[#allocation37_spill]]  ;;  %vm2360_vm11 = vcmask 519168  }
  0x73   : > { %vm3989_vm9 = vmand %vm993_vm7, %vm994_vm8  ;;  %s4643_s15 = sld [smem:[#allocation39_spill]]  ;;  %s4432_s25 = scalar_lea.vmem [#allocation11], %s2573_s24 }
  0x74   : > { %v2901_v0 = vld [vmem:[%s4629_s28 + $0x18] sm:$0xff]  ;;  %v2900_v2 = vld [vmem:[%s4629_s28 + $0x10] sm:$0xff]  ;;  %v2899_v4 = vld [vmem:[%s4629_s28 + $0x8] sm:$0xff]  ;;  %s4644_s24 = sld [smem:[#allocation21_spill]]  ;;  %s2378_s20 = scalar_lea.sflag [#allocation5], %s3725_s18 }
  0x75   : > { %v2906_v1 = vld [vmem:[%s4629_s28 + $0x18] sm:$0xff]  ;;  %634 = vmatpush.bf16.msra.mxu0 %v2901_v0  ;;  %v2905_v3 = vld [vmem:[%s4629_s28 + $0x10] sm:$0xff]  ;;  %2982 = vmatpush.bf16.msra.mxu2 %v2901_v0  ;;  %v2904_v5 = vld [vmem:[%s4629_s28 + $0x8] sm:$0xff]  ;;  %p817_p11 = scmp.gt.s32.totalorder %s4630_s6, 0  ;;  %p827_p12 = scmp.lt.s32.totalorder %s4630_s6, 1 }
  0x76   : > { %779 = vmatpush.bf16.msra.mxu1 %v2906_v1  ;;  %v2898_v6 = vld [vmem:[%s4629_s28] sm:$0xff]  ;;  %s4632_s7 = smov %s4631_s14  ;;  %1458 = vmatpush.bf16.msrb.mxu3 %v2927_v23  ;;  %s2942_s21 = sshll.u32 %s4630_s6, 4 }
  0x77   : > { %v2903_v7 = vld [vmem:[%s4629_s28] sm:$0xff]  ;;  %s818_s23 = scalar_select %p817_p11, 1, 0 }
  0x78   : > { %v3803_v20 = vld [vmem:[%s4631_s14] ss:$0 sm:$0xff]  ;;  %s828_s2 = scalar_select %p827_p12, 1, 0 }
  0x79   : > { %635 = vmatpush.bf16.msra.mxu0 %v2900_v2  ;;  %2983 = vmatpush.bf16.msra.mxu2 %v2900_v2  ;;  %v3808_v21 = vld [vmem:[%s4632_s7] ss:$0 sm:$0xff]  ;;  %v819_v22 = vstv %s818_s23  ;;  %s4645_s14 = sld [smem:[#allocation40_spill]] }
  0x7a   : > { %780 = vmatpush.bf16.msra.mxu1 %v2905_v3  ;;  %vm3812_vm1 = vcmp.eq.s32.totalorder %v819_v22, 1  ;;  %s2879_s8 = sshll.u32 %s4644_s24, 5 }
  0x7b   : > { %s2390_s23 = sadd.s32 %s2942_s21, %s2879_s8 }
  0x7c   : > { %s2880_s5 = sshll.u32 %s2390_s23, 2 }
  0x7d   : > { %636 = vmatpush.bf16.msra.mxu0 %v2899_v4  ;;  %2984 = vmatpush.bf16.msra.mxu2 %v2899_v4 }
  0x7e   : > { %781 = vmatpush.bf16.msra.mxu1 %v2904_v5 }
  0x7f   : > { %s4646_s27 = smov %s4645_s14  ;;  %s2392_s6 = scalar_lea.hbm %s4645_s14, %s2880_s5 }
  0x80   : > { %s3282_s29 = scalar_lea.hbm %s4646_s27, 256 }
  0x81   : > { %637 = vmatpush.bf16.msra.mxu0 %v2898_v6  ;;  %2985 = vmatpush.bf16.msra.mxu2 %v2898_v6 }
  0x82   : > { %782 = vmatpush.bf16.msra.mxu1 %v2903_v7 }
  0x84   : > { %2626 = vmatmul.msk.bf16.vlgmr.msra.gmra.mxu0 %vm605_vm0, %v2890_v8  ;;  %2633 = vmatmul.msk.bf16.vlgmr.msra.gmra.mxu2 %vm605_vm0, %v2897_v14 }
  0x85   : > { %805 = vmatpush.bf16.msrb.mxu2 %v2906_v1  ;;  %2654 = vmatmul.msk.bf16.vlgmr.msra.gmra.mxu1 %vm605_vm0, %v2902_v9 }
  0x86   : > { %1548 = vmatpush.bf16.msrb.mxu0 %v2928_v17  ;;  %1118 = vmatpush.bf16.msrb.mxu1 %v2916_v19 }
  0x89   : > { %806 = vmatpush.bf16.msrb.mxu2 %v2905_v3 }
  0x8d   : > { %807 = vmatpush.bf16.msrb.mxu2 %v2904_v5 }
  0x91   : > { %808 = vmatpush.bf16.msrb.mxu2 %v2903_v7 }
  0x94   : > { %2627 = vmatmul.msk.bf16.gmra.mxu0 %vm605_vm0, %v2891_v10 }
  0x95   : > { %2986 = vmatpush.bf16.msra.mxu2 %v2916_v19 }
  0xa4   : > { %2628 = vmatmul.msk.bf16.gmra.mxu0 %vm605_vm0, %v2892_v11 }
  0xb4   : > { %2629 = vmatmul.msk.bf16.gmra.mxu0 %vm605_vm0, %v2893_v12 }
  0xc4   : > { %2630 = vmatmul.msk.bf16.gmra.mxu0 %vm605_vm0, %v2894_v13 }
  0xd4   : > { %2631 = vmatmul.msk.bf16.gmra.mxu0 %vm605_vm0, %v2895_v15 }
  0xe4   : > { %2632 = vmatmul.msk.bf16.gmra.mxu0 %vm605_vm0, %v2896_v16 }
 0x101   : > { %v639_v24 = vpop.f32.mrf.mxu0 }
 0x102   : > { %v784_v25 = vpop.f32.mrf.mxu1  ;;  %v640_v26 = vadd.f32 %v3803_v20, %v639_v24 }
 0x103   : > { %v785_v27 = vadd.f32 %v3808_v21, %v784_v25 }
 0x104   : > { %v679_v29 = vmax.f32 %v640_v26, 0.0 }
 0x105   : > { %v789_v30 = vmax.f32 %v785_v27, 0.0 }
 0x106   : > { %v695_v31 = vpack.c.bf16 %v679_v29, %v679_v29 }
 0x107   : > { %v821_v32 = vsel %vm3812_vm1, %v789_v30, 0.0 }
 0x108   : > { %v823_v33 = vpack.c.bf16 %v821_v32, %v821_v32  ;;  %713 = vst.msk [vmem:[#allocation2 + $0x8] sm:$0xf] %vm712_vm2, %v695_v31 }
 0x109   : > { %v641_v34 = vpop.f32.mrf.mxu0 }
 0x10a   : > { %825 = vst.msk [vmem:[#allocation2] sm:$0xf] %vm712_vm2, %v823_v33  ;;  %v786_v35 = vpop.f32.mrf.mxu1  ;;  %v642_v36 = vadd.f32 %v3803_v20, %v641_v34 }
 0x10b   : > { %v787_v37 = vadd.f32 %v3808_v21, %v786_v35 }
 0x10c   : > { %v680_v38 = vmax.f32 %v642_v36, 0.0 }
 0x10d   : > { %v790_v39 = vmax.f32 %v787_v37, 0.0 }
 0x10e   : > { %v696_v40 = vpack.c.bf16 %v680_v38, %v680_v38 }
 0x10f   : > { %v822_v41 = vsel %vm3812_vm1, %v790_v39, 0.0 }
 0x110   : > { %v824_v42 = vpack.c.bf16 %v822_v41, %v822_v41  ;;  %714 = vst.msk [vmem:[#allocation2 + $0xc] sm:$0xf] %vm712_vm2, %v696_v40 }
 0x111   : > { %v644_v43 = vpop.f32.mrf.mxu0 }
 0x112   : > { %826 = vst.msk [vmem:[#allocation2 + $0x4] sm:$0xf] %vm712_vm2, %v824_v42  ;;  %v645_v44 = vadd.f32 %v3803_v20, %v644_v43  ;;  %v2907_v42 = vld [vmem:[%s451_s17] sm:$0xff]  ;;  %s2395_s17 = sshll.u32 %s2392_s6, 4  ;;  %s2396_s17 = int_to_ptr.hbm [resolvable:$true] %s2395_s17 }
 0x113   : > { %2659 = vmatmul.msk.bf16.vlgmr.msrb.gmra.mxu2 %vm605_vm0, %v2907_v42 }
 0x114   : > { %v681_v45 = vmax.f32 %v645_v44, 0.0 }
 0x116   : > { %v697_v46 = vpack.c.bf16 %v681_v45, %v681_v45 }
 0x117   : > { %v3827_v47 = vld [vmem:[#allocation2 + $0x8] sm:$0xff] }
 0x118   : > { %v2909_v48 = vld [vmem:[#allocation2 + $0x8] sm:$0xff]  ;;  %715 = vst.msk [vmem:[#allocation2 + $0x10] sm:$0xf] %vm712_vm2, %v697_v46  ;;  %2776 = vmatmul.msk.bf16.vlgmr.msrb.gmra.mxu0 %vm1015_vm3, %v3827_v47 }
 0x119   : > { %v2908_v49 = vld [vmem:[#allocation2] sm:$0xff]  ;;  %v646_v50 = vpop.f32.mrf.mxu0  ;;  %v905_v51 = vshll.u32 %v2909_v48, 16  ;;  %v902_v55 = vshrl.u32 %v2909_v48, 16 }
 0x11a   : > { %v647_v52 = vadd.f32 %v3803_v20, %v646_v50  ;;  %v895_v53 = vshrl.u32 %v2908_v49, 16  ;;  %2696 = vmatmul.msk.bf16.vlgmr.msra.gmra.mxu3 %vm1015_vm3, %v2908_v49  ;;  %v898_v54 = vshll.u32 %v2908_v49, 16 }
 0x11b   : > { %v971_v56 = vrot.slane %v905_v51, 1  ;;  %v904_v9 = vrot.slane %v902_v55, 7 }
 0x11c   : > { %v682_v57 = vmax.f32 %v647_v52, 0.0  ;;  %v897_v58 = vrot.slane %v895_v53, 7  ;;  %v969_v59 = vrot.slane %v898_v54, 1 }
 0x11d   : > { %v3838_v61 = vor.u32 %v971_v56, %v902_v55  ;;  %v907_v17 = vor.u32 %v905_v51, %v904_v9 }
 0x11e   : > { %v698_v62 = vpack.c.bf16 %v682_v57, %v682_v57  ;;  %v900_v63 = vor.u32 %v898_v54, %v897_v58  ;;  %v3840_v0 = vor.u32 %v969_v59, %v895_v53 }
 0x11f   : > { %v962_v25 = vsel %vm3834_vm6, 0, %v907_v17  ;;  %v2918_v17 = vld [vmem:[#allocation9 + $0x10] sm:$0xff] }
 0x120   : > { %716 = vst.msk [vmem:[#allocation2 + $0x14] sm:$0xf] %vm712_vm2, %v698_v62  ;;  %v961_v1 = vsel %vm3834_vm6, 0, %v900_v63  ;;  %1200 = vmatpush.bf16.msrb.mxu2 %v2918_v17 }
 0x121   : > { %v649_v2 = vpop.f32.mrf.mxu0  ;;  %2708 = vmatmul.msk.bf16.vlgmr.msrb.gmra.mxu1 %vm1015_vm3, %v961_v1 }
 0x122   : > { %v650_v3 = vadd.f32 %v3803_v20, %v649_v2 }
 0x124   : > { %v683_v4 = vmax.f32 %v650_v3, 0.0 }
 0x126   : > { %v699_v5 = vpack.c.bf16 %v683_v4, %v683_v4 }
 0x127   : > { %v3847_v6 = vld [vmem:[#allocation2 + $0x10] sm:$0xff] }
 0x128   : > { %v2910_v7 = vld [vmem:[#allocation2 + $0x10] sm:$0xff]  ;;  %717 = vst.msk [vmem:[#allocation2 + $0x18] sm:$0xf] %vm712_vm2, %v699_v5  ;;  %2777 = vmatmul.msk.bf16.gmra.mxu0 %vm1015_vm3, %v3847_v6 }
 0x129   : > { %v3849_v8 = vld [vmem:[#allocation2 + $0x10] sm:$0xff]  ;;  %v651_v10 = vpop.f32.mrf.mxu0  ;;  %v912_v11 = vshll.u32 %v2910_v7, 16  ;;  %v909_v14 = vshrl.u32 %v2910_v7, 16 }
 0x12a   : > { %v652_v12 = vadd.f32 %v3803_v20, %v651_v10  ;;  %2697 = vmatmul.msk.bf16.gmra.mxu3 %vm1015_vm3, %v2909_v48  ;;  %v1762_v13 = vshrl.u32 %v3849_v8, 16  ;;  %v1765_v18 = vshll.u32 %v3849_v8, 16 }
 0x12b   : > { %v973_v15 = vrot.slane %v912_v11, 1  ;;  %v911_v33 = vrot.slane %v909_v14, 7 }
 0x12c   : > { %v684_v16 = vmax.f32 %v652_v12, 0.0  ;;  %v1764_v19 = vrot.slane %v1762_v13, 7 }
 0x12d   : > { %v3860_v22 = vor.u32 %v973_v15, %v909_v14  ;;  %v914_v41 = vor.u32 %v912_v11, %v911_v33  ;;  %v674_v14 = vpop.f32.mrf.mxu2 }
 0x12e   : > { %v700_v23 = vpack.c.bf16 %v684_v16, %v684_v16  ;;  %v3864_v24 = vor.u32 %v1765_v18, %v1764_v19  ;;  %v675_v16 = vadd.f32 %v3803_v20, %v674_v14 }
 0x12f   : > { %v963_v49 = vsel %vm3834_vm6, 0, %v914_v41 }
 0x130   : > { %718 = vst.msk [vmem:[#allocation2 + $0x1c] sm:$0xf] %vm712_vm2, %v700_v23  ;;  %v693_v23 = vmax.f32 %v675_v16, 0.0 }
 0x131   : > { %v654_v26 = vpop.f32.mrf.mxu0  ;;  %2709 = vmatmul.msk.bf16.gmra.mxu1 %vm1015_vm3, %v962_v25 }
 0x132   : > { %v655_v27 = vadd.f32 %v3803_v20, %v654_v26  ;;  %v709_v26 = vpack.c.bf16 %v693_v23, %v693_v23 }
 0x134   : > { %v685_v28 = vmax.f32 %v655_v27, 0.0  ;;  %727 = vst.msk [vmem:[#allocation2 + $0x40] sm:$0xf] %vm712_vm2, %v709_v26 }
 0x136   : > { %v701_v29 = vpack.c.bf16 %v685_v28, %v685_v28 }
 0x137   : > { %v3871_v30 = vld [vmem:[#allocation2 + $0x18] sm:$0xff] }
 0x138   : > { %v2911_v31 = vld [vmem:[#allocation2 + $0x18] sm:$0xff]  ;;  %719 = vst.msk [vmem:[#allocation2 + $0x20] sm:$0xf] %vm712_vm2, %v701_v29  ;;  %2778 = vmatmul.msk.bf16.gmra.mxu0 %vm1015_vm3, %v3871_v30 }
 0x139   : > { %v3873_v32 = vld [vmem:[#allocation2 + $0x18] sm:$0xff]  ;;  %v656_v34 = vpop.f32.mrf.mxu0  ;;  %v919_v35 = vshll.u32 %v2911_v31, 16  ;;  %v916_v38 = vshrl.u32 %v2911_v31, 16 }
 0x13a   : > { %v657_v36 = vadd.f32 %v3803_v20, %v656_v34  ;;  %2698 = vmatmul.msk.bf16.gmra.mxu3 %vm1015_vm3, %v2910_v7  ;;  %v1769_v37 = vshrl.u32 %v3873_v32, 16  ;;  %v1772_v43 = vshll.u32 %v3873_v32, 16  ;;  %v676_v34 = vpop.f32.mrf.mxu2 }
 0x13b   : > { %v975_v39 = vrot.slane %v919_v35, 1  ;;  %v918_v57 = vrot.slane %v916_v38, 7 }
 0x13c   : > { %v686_v40 = vmax.f32 %v657_v36, 0.0  ;;  %v1771_v44 = vrot.slane %v1769_v37, 7 }
 0x13d   : > { %v3886_v45 = vor.u32 %v975_v39, %v916_v38  ;;  %v921_v4 = vor.u32 %v919_v35, %v918_v57  ;;  %v677_v38 = vadd.f32 %v3803_v20, %v676_v34 }
 0x13e   : > { %v702_v46 = vpack.c.bf16 %v686_v40, %v686_v40  ;;  %v3891_v48 = vor.u32 %v1772_v43, %v1771_v44  ;;  %v2929_v40 = vld [vmem:[#allocation9 + $0x28] sm:$0xff] }
 0x13f   : > { %v964_v12 = vsel %vm3834_vm6, 0, %v921_v4  ;;  %v694_v44 = vmax.f32 %v677_v38, 0.0  ;;  %1646 = vmatpush.bf16.msra.mxu1 %v2929_v40  ;;  %v1318_v40 = vshll.u32 %v3827_v47, 16 }
 0x140   : > { %720 = vst.msk [vmem:[#allocation2 + $0x24] sm:$0xf] %vm712_vm2, %v702_v46 }
 0x141   : > { %v659_v50 = vpop.f32.mrf.mxu0  ;;  %2710 = vmatmul.msk.bf16.gmra.mxu1 %vm1015_vm3, %v963_v49 }
 0x142   : > { %v660_v51 = vadd.f32 %v3803_v20, %v659_v50 }
 0x144   : > { %v687_v52 = vmax.f32 %v660_v51, 0.0 }
 0x146   : > { %v703_v53 = vpack.c.bf16 %v687_v52, %v687_v52 }
 0x147   : > { %v3898_v54 = vld [vmem:[#allocation2 + $0x20] sm:$0xff] }
 0x148   : > { %v2912_v55 = vld [vmem:[#allocation2 + $0x20] sm:$0xff]  ;;  %721 = vst.msk [vmem:[#allocation2 + $0x28] sm:$0xf] %vm712_vm2, %v703_v53  ;;  %2779 = vmatmul.msk.bf16.gmra.mxu0 %vm1015_vm3, %v3898_v54  ;;  %v710_v53 = vpack.c.bf16 %v694_v44, %v694_v44 }
 0x149   : > { %v3900_v56 = vld [vmem:[#allocation2 + $0x20] sm:$0xff]  ;;  %v661_v58 = vpop.f32.mrf.mxu0  ;;  %v926_v59 = vshll.u32 %v2912_v55, 16  ;;  %v923_v1 = vshrl.u32 %v2912_v55, 16 }
 0x14a   : > { %v662_v62 = vadd.f32 %v3803_v20, %v661_v58  ;;  %2699 = vmatmul.msk.bf16.gmra.mxu3 %vm1015_vm3, %v2911_v31  ;;  %v1776_v63 = vshrl.u32 %v3900_v56, 16  ;;  %v1779_v5 = vshll.u32 %v3900_v56, 16  ;;  %728 = vst.msk [vmem:[#allocation2 + $0x44] sm:$0xf] %vm712_vm2, %v710_v53  ;;  %v2938_v44 = vld [vmem:[#allocation9 + $0x30] sm:$0xff] }
 0x14b   : > { %v977_v2 = vrot.slane %v926_v59, 1  ;;  %v925_v33 = vrot.slane %v923_v1, 7 }
 0x14c   : > { %v688_v3 = vmax.f32 %v662_v62, 0.0  ;;  %v1778_v7 = vrot.slane %v1776_v63, 7 }
 0x14d   : > { %v3911_v9 = vor.u32 %v977_v2, %v923_v1  ;;  %v928_v50 = vor.u32 %v926_v59, %v925_v33 }
 0x14e   : > { %v704_v10 = vpack.c.bf16 %v688_v3, %v688_v3  ;;  %v3915_v11 = vor.u32 %v1779_v5, %v1778_v7 }
 0x14f   : > { %v965_v59 = vsel %vm3834_vm6, 0, %v928_v50 }
 0x150   : > { %722 = vst.msk [vmem:[#allocation2 + $0x2c] sm:$0xf] %vm712_vm2, %v704_v10 }
 0x151   : > { %v664_v15 = vpop.f32.mrf.mxu0  ;;  %2711 = vmatmul.msk.bf16.gmra.mxu1 %vm1015_vm3, %v964_v12 }
 0x152   : > { %v665_v19 = vadd.f32 %v3803_v20, %v664_v15 }
 0x154   : > { %v689_v25 = vmax.f32 %v665_v19, 0.0 }
 0x156   : > { %v705_v27 = vpack.c.bf16 %v689_v25, %v689_v25 }
 0x157   : > { %v3923_v28 = vld [vmem:[#allocation2 + $0x28] sm:$0xff] }
 0x158   : > { %v2913_v29 = vld [vmem:[#allocation2 + $0x28] sm:$0xff]  ;;  %723 = vst.msk [vmem:[#allocation2 + $0x30] sm:$0xf] %vm712_vm2, %v705_v27  ;;  %2780 = vmatmul.msk.bf16.gmra.mxu0 %vm1015_vm3, %v3923_v28 }
 0x159   : > { %v3926_v31 = vld [vmem:[#allocation2 + $0x28] sm:$0xff]  ;;  %v666_v35 = vpop.f32.mrf.mxu0  ;;  %v933_v36 = vshll.u32 %v2913_v29, 16  ;;  %v930_v42 = vshrl.u32 %v2913_v29, 16 }
 0x15a   : > { %v667_v39 = vadd.f32 %v3803_v20, %v666_v35  ;;  %2700 = vmatmul.msk.bf16.gmra.mxu3 %vm1015_vm3, %v2912_v55  ;;  %v1783_v41 = vshrl.u32 %v3926_v31, 16  ;;  %v1786_v51 = vshll.u32 %v3926_v31, 16 }
 0x15b   : > { %v979_v46 = vrot.slane %v933_v36, 1  ;;  %v932_v12 = vrot.slane %v930_v42, 7 }
 0x15c   : > { %v690_v49 = vmax.f32 %v667_v39, 0.0  ;;  %v1785_v52 = vrot.slane %v1783_v41, 7 }
 0x15d   : > { %v3938_v57 = vor.u32 %v979_v46, %v930_v42  ;;  %v935_v27 = vor.u32 %v933_v36, %v932_v12  ;;  %v2940_v42 = vld [vmem:[#allocation9 + $0x40] sm:$0xff] }
 0x15e   : > { %v706_v58 = vpack.c.bf16 %v690_v49, %v690_v49  ;;  %v3942_v55 = vor.u32 %v1786_v51, %v1785_v52  ;;  %2093 = vmatpush.bf16.msra.mxu0 %v2940_v42  ;;  %v1386_v52 = vrot.slane %v1318_v40, 1  ;;  %v1833_v42 = vrot.slane %v1765_v18, 1 }
 0x15f   : > { %v966_v36 = vsel %vm3834_vm6, 0, %v935_v27  ;;  %v4006_v27 = vld [vmem:[#allocation2 + $0x40] sm:$0xff]  ;;  %v1329_v18 = vshrl.u32 %v3871_v30, 16 }
 0x160   : > { %724 = vst.msk [vmem:[#allocation2 + $0x34] sm:$0xf] %vm712_vm2, %v706_v58 }
 0x161   : > { %v669_v62 = vpop.f32.mrf.mxu0  ;;  %2712 = vmatmul.msk.bf16.gmra.mxu1 %vm1015_vm3, %v965_v59  ;;  %v1315_v59 = vshrl.u32 %v3827_v47, 16 }
 0x162   : > { %v670_v1 = vadd.f32 %v3803_v20, %v669_v62  ;;  %v2939_v62 = vld [vmem:[#allocation9 + $0x38] sm:$0xff] }
 0x163   : > { %v1387_v12 = vor.u32 %v1386_v52, %v1315_v59  ;;  %1995 = vmatpush.bf16.msra.mxu3 %v2939_v62 }
 0x164   : > { %v691_v2 = vmax.f32 %v670_v1, 0.0 }
 0x166   : > { %v707_v3 = vpack.c.bf16 %v691_v2, %v691_v2 }
 0x167   : > { %v3950_v4 = vld [vmem:[#allocation2 + $0x30] sm:$0xff] }
 0x168   : > { %v2914_v7 = vld [vmem:[#allocation2 + $0x30] sm:$0xff]  ;;  %725 = vst.msk [vmem:[#allocation2 + $0x38] sm:$0xf] %vm712_vm2, %v707_v3  ;;  %2781 = vmatmul.msk.bf16.gmra.mxu0 %vm1015_vm3, %v3950_v4 }
 0x169   : > { %v3952_v10 = vld [vmem:[#allocation2 + $0x30] sm:$0xff]  ;;  %v671_v14 = vpop.f32.mrf.mxu0  ;;  %v937_v15 = vshrl.u32 %v2914_v7, 16  ;;  %v940_v16 = vshll.u32 %v2914_v7, 16 }
 0x16a   : > { %v672_v17 = vadd.f32 %v3803_v20, %v671_v14  ;;  %2701 = vmatmul.msk.bf16.gmra.mxu3 %vm1015_vm3, %v2913_v29  ;;  %v1790_v19 = vshrl.u32 %v3952_v10, 16  ;;  %v1793_v33 = vshll.u32 %v3952_v10, 16 }
 0x16b   : > { %v939_v23 = vrot.slane %v937_v15, 7  ;;  %v981_v25 = vrot.slane %v940_v16, 1 }
 0x16c   : > { %v692_v26 = vmax.f32 %v672_v17, 0.0  ;;  %v1792_v34 = vrot.slane %v1790_v19, 7  ;;  %v2941_v17 = vld [vmem:[%s4641_s19] sm:$0xff]  ;;  %s3276_s19 = sshra.s32 %s2396_s17, 4  ;;  %s3277_s19 = int_to_ptr.hbm [resolvable:$true] %s3276_s19 }
 0x16d   : > { %v942_v35 = vor.u32 %v940_v16, %v939_v23  ;;  %v3963_v38 = vor.u32 %v981_v25, %v937_v15  ;;  %v1410_v25 = vsel %vm3989_vm9, %v1387_v12, 0  ;;  %v1835_v12 = vrot.slane %v1772_v43, 1  ;;  %2238 = vmatpush.bf16.msrb.mxu1 %v2941_v17  ;;  %s3278_s3 = scalar_lea.hbm %s3277_s19, 64  ;;  %p3283_p0 = scmp.lt.s32.totalorder %s3277_s19, %s4646_s27 }
 0x16e   : > { %v708_v39 = vpack.c.bf16 %v692_v26, %v692_v26  ;;  %v3967_v20 = vor.u32 %v1793_v33, %v1792_v34  ;;  %v1325_v26 = vshll.u32 %v3847_v6, 16  ;;  %p3279_p2 = scmp.ne.s32.totalorder %s3277_s19, %s3278_s3  ;;  %p3284_p3 = scmp.lt.s32.totalorder %s3282_s29, %s3278_s3 }
 0x16f   : > { %v967_v29 = vsel %vm3834_vm6, 0, %v942_v35  ;;  %v1322_v35 = vshrl.u32 %v3847_v6, 16  ;;  %v1332_v6 = vshll.u32 %v3871_v30, 16 }
 0x170   : > { %726 = vst.msk [vmem:[#allocation2 + $0x3c] sm:$0xf] %vm712_vm2, %v708_v39  ;;  %2714 = vmatmul.msk.bf16.vlgmr.msra.gmra.mxu2 %vm1015_vm3, %v967_v29  ;;  %v1388_v34 = vrot.slane %v1325_v26, 1  ;;  %v996_v29 = vsel %vm3989_vm9, %v3840_v0, 0  ;;  %p3280_p4 = pnand %p3279_p2, %p3662_p10  ;;  %p3285_p7 = por %p3284_p3, %p3283_p0 }
 0x171   : > { %2713 = vmatmul.msk.bf16.gmra.mxu1 %vm1015_vm3, %v966_v36  ;;  %1905 = vmatpush.bf16.msra.mxu2 %v2938_v44  ;;  %v1317_v44 = vrot.slane %v1315_v59, 7  ;;  %v1324_v30 = vrot.slane %v1322_v35, 7 }
 0x172   : > { %v1389_v39 = vor.u32 %v1388_v34, %v1322_v35  ;;  %p3281_p5 = pneg %p3280_p4 }
 0x173   : > { %v1320_v52 = vor.u32 %v1318_v40, %v1317_v44  ;;  %v997_v40 = vsel %vm3989_vm9, %v3838_v61, 0  ;;  %v998_v44 = vsel %vm3989_vm9, %v3860_v22, 0 }
 0x174   : > { %v1411_v36 = vsel %vm3989_vm9, %v1389_v39, 0  ;;  %p3286_p13 = pnand %p3285_p7, %p3281_p5 }
 0x177   : > { %v3977_v46 = vld [vmem:[#allocation2 + $0x38] sm:$0xff] }
 0x178   : > { %v2915_v49 = vld [vmem:[#allocation2 + $0x38] sm:$0xff]  ;;  %2782 = vmatmul.msk.bf16.gmra.mxu0 %vm1015_vm3, %v3977_v46 }
 0x179   : > { %v3979_v50 = vld [vmem:[#allocation2 + $0x38] sm:$0xff]  ;;  %v944_v53 = vshrl.u32 %v2915_v49, 16  ;;  %v947_v58 = vshll.u32 %v2915_v49, 16 }
 0x17a   : > { %2702 = vmatmul.msk.bf16.gmra.mxu3 %vm1015_vm3, %v2914_v7  ;;  %v1797_v1 = vshrl.u32 %v3979_v50, 16  ;;  %v1800_v14 = vshll.u32 %v3979_v50, 16 }
 0x17b   : > { %v946_v2 = vrot.slane %v944_v53, 7  ;;  %v983_v3 = vrot.slane %v947_v58, 1 }
 0x17c   : > { %v1799_v15 = vrot.slane %v1797_v1, 7 }
 0x17d   : > { %v949_v16 = vor.u32 %v947_v58, %v946_v2  ;;  %v3993_v7 = vor.u32 %v983_v3, %v944_v53  ;;  %v1390_v53 = vrot.slane %v1332_v6, 1  ;;  %v1378_v58 = vsel %vm3834_vm6, 0, %v1320_v52 }
 0x17e   : > { %v3997_v47 = vor.u32 %v1800_v14, %v1799_v15  ;;  %v1836_v15 = vor.u32 %v1835_v12, %v1769_v37  ;;  %v1336_v37 = vshrl.u32 %v3898_v54, 16  ;;  %v1837_v52 = vrot.slane %v1779_v5, 1 }
 0x17f   : > { %v968_v23 = vsel %vm3834_vm6, 0, %v949_v16  ;;  %v1391_v59 = vor.u32 %v1390_v53, %v1329_v18  ;;  %v1339_v16 = vshll.u32 %v3898_v54, 16  ;;  %v1331_v54 = vrot.slane %v1329_v18, 7 }
 0x180   : > { %2715 = vmatmul.msk.bf16.gmra.mxu2 %vm1015_vm3, %v968_v23  ;;  %v1858_v39 = vsel %vm3989_vm9, %v1836_v15, 0  ;;  %v1346_v53 = vshll.u32 %v3923_v28, 16 }
 0x181   : > { %2788 = vmatmul.msk.bf16.vlgmr.msra.gmra.mxu1 %vm1015_vm3, %v1410_v25  ;;  %v1412_v3 = vsel %vm3989_vm9, %v1391_v59, 0  ;;  %v1327_v25 = vor.u32 %v1325_v26, %v1324_v30  ;;  %v1334_v59 = vor.u32 %v1332_v6, %v1331_v54  ;;  %v999_v30 = vsel %vm3989_vm9, %v3886_v45, 0 }
 0x183   : > { %v1379_v43 = vsel %vm3834_vm6, 0, %v1327_v25  ;;  %v1380_v5 = vsel %vm3834_vm6, 0, %v1334_v59  ;;  %v829_v25 = vstv %s828_s2  ;;  %v1350_v59 = vshrl.u32 %v3950_v4, 16  ;;  %s2393_s2 = sshll.u32 %s4432_s25, 4  ;;  %s2394_s2 = int_to_ptr.vmem [resolvable:$true] %s2393_s2 }
 0x184   : > { %vm4094_vm10 = vcmp.eq.s32.totalorder %v829_v25, 1 }
 0x188   : > { %2783 = vmatmul.msk.bf16.gmra.mxu0 %vm1015_vm3, %v4006_v27 }
 0x18a   : > { %2703 = vmatmul.msk.bf16.gmra.mxu3 %vm1015_vm3, %v2915_v49  ;;  %v1834_v49 = vor.u32 %v1833_v42, %v1762_v13 }
 0x18c   : > { %v1857_v0 = vsel %vm3989_vm9, %v1834_v49, 0 }
 0x190   : > { %2720 = vmatmul.msk.bf16.vlgmr.msrb.gmra.mxu2 %vm1015_vm3, %v996_v29  ;;  %v1392_v29 = vrot.slane %v1339_v16, 1 }
 0x191   : > { %2789 = vmatmul.msk.bf16.gmra.mxu1 %vm1015_vm3, %v1411_v36 }
 0x192   : > { %v1393_v35 = vor.u32 %v1392_v29, %v1336_v37 }
 0x194   : > { %v1413_v49 = vsel %vm3989_vm9, %v1393_v35, 0  ;;  %v1841_v35 = vrot.slane %v1793_v33, 1 }
 0x198   : > { %2856 = vmatmul.msk.bf16.vlgmr.msra.gmra.mxu0 %vm1015_vm3, %v1857_v0  ;;  %v1838_v0 = vor.u32 %v1837_v52, %v1776_v63  ;;  %v1343_v63 = vshrl.u32 %v3923_v28, 16  ;;  %v1357_v28 = vshrl.u32 %v3977_v46, 16 }
 0x19a   : > { %2764 = vmatmul.msk.bf16.vlgmr.msrb.gmra.mxu3 %vm1015_vm3, %v1378_v58 }
 0x19d   : > { %v1041_v62 = vpop.f32.mrf.mxu3 }
 0x19e   : > { %v1120_v2 = vpop.f32.mrf.mxu1 }
 0x19f   : > { %v4031_v13 = vadd.f32 %v1120_v2, %v1041_v62  ;;  %v1859_v2 = vsel %vm3989_vm9, %v1838_v0, 0 }
 0x1a0   : > { %2721 = vmatmul.msk.bf16.gmra.mxu2 %vm1015_vm3, %v997_v40  ;;  %v1394_v40 = vrot.slane %v1346_v53, 1 }
 0x1a1   : > { %2790 = vmatmul.msk.bf16.gmra.mxu1 %vm1015_vm3, %v1412_v3 }
 0x1a2   : > { %v1395_v6 = vor.u32 %v1394_v40, %v1343_v63 }
 0x1a4   : > { %v1414_v15 = vsel %vm3989_vm9, %v1395_v6, 0 }
 0x1a5   : > { %v1043_v23 = vpop.f32.mrf.mxu3 }
 0x1a6   : > { %v1122_v34 = vpop.f32.mrf.mxu1 }
 0x1a7   : > { %v4045_v61 = vadd.f32 %v1122_v34, %v1043_v23  ;;  %v1839_v23 = vrot.slane %v1786_v51, 1  ;;  %v1338_v34 = vrot.slane %v1336_v37, 7 }
 0x1a8   : > { %2857 = vmatmul.msk.bf16.gmra.mxu0 %vm1015_vm3, %v1858_v39  ;;  %v810_v39 = vpop.f32.mrf.mxu2 }
 0x1a9   : > { %v811_v29 = vadd.f32 %v3808_v21, %v810_v39  ;;  %v1840_v45 = vor.u32 %v1839_v23, %v1783_v41 }
 0x1aa   : > { %2765 = vmatmul.msk.bf16.gmra.mxu3 %vm1015_vm3, %v1379_v43  ;;  %v4092_v43 = vpop.f32.mrf.mxu0 }
 0x1ab   : > { %v1860_v54 = vsel %vm3989_vm9, %v1840_v45, 0  ;;  %v1345_v45 = vrot.slane %v1343_v63, 7 }
 0x1ad   : > { %v1046_v36 = vpop.f32.mrf.mxu3 }
 0x1ae   : > { %v1125_v42 = vpop.f32.mrf.mxu1 }
 0x1af   : > { %v4054_v26 = vadd.f32 %v1125_v42, %v1046_v36  ;;  %v1353_v36 = vshll.u32 %v3950_v4, 16  ;;  %v815_v42 = vmax.f32 %v811_v29, 0.0 }
 0x1b0   : > { %2722 = vmatmul.msk.bf16.gmra.mxu2 %vm1015_vm3, %v998_v44  ;;  %v1341_v44 = vor.u32 %v1339_v16, %v1338_v34  ;;  %v812_v16 = vpop.f32.mrf.mxu2  ;;  %v1000_v34 = vsel %vm3989_vm9, %v3911_v9, 0 }
 0x1b1   : > { %2791 = vmatmul.msk.bf16.gmra.mxu1 %vm1015_vm3, %v1413_v49  ;;  %v831_v37 = vsel %vm4094_vm10, %v815_v42, 0.0  ;;  %v1396_v0 = vrot.slane %v1353_v36, 1  ;;  %v1842_v42 = vor.u32 %v1841_v35, %v1790_v19 }
 0x1b2   : > { %v833_v52 = vpack.c.bf16 %v831_v37, %v831_v37  ;;  %v1381_v41 = vsel %vm3834_vm6, 0, %v1341_v44  ;;  %v1360_v44 = vshll.u32 %v3977_v46, 16  ;;  %v1348_v37 = vor.u32 %v1346_v53, %v1345_v45 }
 0x1b3   : > { %v1397_v40 = vor.u32 %v1396_v0, %v1350_v59  ;;  %v1861_v33 = vsel %vm3989_vm9, %v1842_v42, 0 }
 0x1b4   : > { %836 = vst.msk [vmem:[#allocation2 + $0x48] sm:$0xf] %vm712_vm2, %v833_v52  ;;  %v1398_v63 = vrot.slane %v1360_v44, 1  ;;  %v1382_v19 = vsel %vm3834_vm6, 0, %v1348_v37 }
 0x1b5   : > { %v1048_v58 = vpop.f32.mrf.mxu3  ;;  %v1415_v29 = vsel %vm3989_vm9, %v1397_v40, 0 }
 0x1b6   : > { %v1127_v62 = vpop.f32.mrf.mxu1 }
 0x1b7   : > { %v4068_v22 = vadd.f32 %v1127_v62, %v1048_v58  ;;  %v4111_v58 = vld [vmem:[#allocation2 + $0x40] sm:$0xff]  ;;  %v813_v62 = vadd.f32 %v3808_v21, %v812_v16 }
 0x1b8   : > { %2858 = vmatmul.msk.bf16.gmra.mxu0 %vm1015_vm3, %v1859_v2  ;;  %v1804_v2 = vshrl.u32 %v4111_v58, 16  ;;  %v1807_v6 = vshll.u32 %v4111_v58, 16 }
 0x1ba   : > { %2766 = vmatmul.msk.bf16.gmra.mxu3 %vm1015_vm3, %v1380_v5  ;;  %v816_v5 = vmax.f32 %v813_v62, 0.0 }
 0x1bc   : > { %v832_v23 = vsel %vm4094_vm10, %v816_v5, 0.0 }
 0x1bd   : > { %v1051_v18 = vpop.f32.mrf.mxu3  ;;  %v834_v39 = vpack.c.bf16 %v832_v23, %v832_v23  ;;  %v1843_v23 = vrot.slane %v1800_v14, 1 }
 0x1be   : > { %v1130_v3 = vpop.f32.mrf.mxu1 }
 0x1bf   : > { %v4080_v12 = vadd.f32 %v1130_v3, %v1051_v18  ;;  %v1806_v18 = vrot.slane %v1804_v2, 7  ;;  %v4124_v3 = vpop.f32.mrf.mxu0  ;;  %837 = vst.msk [vmem:[#allocation2 + $0x4c] sm:$0xf] %vm712_vm2, %v834_v39  ;;  %v1352_v39 = vrot.slane %v1350_v59, 7 }
 0x1c0   : > { %2723 = vmatmul.msk.bf16.gmra.mxu2 %vm1015_vm3, %v999_v30 }
 0x1c1   : > { %2792 = vmatmul.msk.bf16.gmra.mxu1 %vm1015_vm3, %v1414_v15  ;;  %v4130_v25 = vor.u32 %v1807_v6, %v1806_v18  ;;  %v1355_v45 = vor.u32 %v1353_v36, %v1352_v39 }
 0x1c3   : > { %v1383_v59 = vsel %vm3834_vm6, 0, %v1355_v45 }
 0x1c5   : > { %v4101_v51 = vpop.f32.mrf.mxu3 }
 0x1c6   : > { %v4103_v49 = vpop.f32.mrf.mxu1  ;;  %v4160_v0 = vld [vmem:[#allocation2 + $0x48] sm:$0xff] }
 0x1c7   : > { %v1811_v53 = vshrl.u32 %v4160_v0, 16  ;;  %v1814_v62 = vshll.u32 %v4160_v0, 16 }
 0x1c8   : > { %2859 = vmatmul.msk.bf16.gmra.mxu0 %vm1015_vm3, %v1860_v54  ;;  %v4153_v54 = vpop.f32.mrf.mxu0 }
 0x1c9   : > { %v1813_v40 = vrot.slane %v1811_v53, 7 }
 0x1ca   : > { %2767 = vmatmul.msk.bf16.gmra.mxu3 %vm1015_vm3, %v1381_v41  ;;  %v1399_v41 = vor.u32 %v1398_v63, %v1357_v28 }
 0x1cc   : > { %v1416_v46 = vsel %vm3989_vm9, %v1399_v41, 0 }
 0x1cd   : > { %v1056_v30 = vpop.f32.mrf.mxu3 }
 0x1ce   : > { %v1135_v15 = vpop.f32.mrf.mxu1 }
 0x1cf   : > { %v4132_v21 = vadd.f32 %v1135_v15, %v1056_v30  ;;  %v1001_v30 = vsel %vm3989_vm9, %v3938_v57, 0  ;;  %v4171_v15 = vor.u32 %v1814_v62, %v1813_v40  ;;  %v1844_v57 = vor.u32 %v1843_v23, %v1797_v1 }
 0x1d0   : > { %2724 = vmatmul.msk.bf16.gmra.mxu2 %vm1015_vm3, %v1000_v34  ;;  %v4178_v34 = vpop.f32.mrf.mxu0  ;;  %v1359_v40 = vrot.slane %v1357_v28, 7 }
 0x1d1   : > { %2793 = vmatmul.msk.bf16.gmra.mxu1 %vm1015_vm3, %v1415_v29  ;;  %v1367_v29 = vshll.u32 %v4006_v27, 16  ;;  %v1862_v14 = vsel %vm3989_vm9, %v1844_v57, 0 }
 0x1d2   : > { %v1362_v39 = vor.u32 %v1360_v44, %v1359_v40  ;;  %v1003_v44 = vsel %vm3989_vm9, %v3993_v7, 0 }
 0x1d3   : > { %v1400_v37 = vrot.slane %v1367_v29, 1 }
 0x1d5   : > { %v4147_v9 = vpop.f32.mrf.mxu3 }
 0x1d6   : > { %v4151_v52 = vpop.f32.mrf.mxu1 }
 0x1d8   : > { %2860 = vmatmul.msk.bf16.gmra.mxu0 %vm1015_vm3, %v1861_v33  ;;  %v1364_v33 = vshrl.u32 %v4006_v27, 16  ;;  %v4197_v63 = vpop.f32.mrf.mxu0  ;;  %v1002_v27 = vsel %vm3989_vm9, %v3963_v38, 0 }
 0x1da   : > { %2768 = vmatmul.msk.bf16.gmra.mxu3 %vm1015_vm3, %v1382_v19  ;;  %v1401_v1 = vor.u32 %v1400_v37, %v1364_v33  ;;  %v1847_v37 = vrot.slane %v1814_v62, 1 }
 0x1dc   : > { %v1417_v19 = vsel %vm3989_vm9, %v1401_v1, 0  ;;  %v1848_v1 = vor.u32 %v1847_v37, %v1811_v53  ;;  %v1825_v53 = vsel %vm3834_vm6, 0, %v3864_v24 }
 0x1dd   : > { %v1061_v16 = vpop.f32.mrf.mxu3 }
 0x1de   : > { %v1140_v5 = vpop.f32.mrf.mxu1 }
 0x1df   : > { %v4166_v18 = vadd.f32 %v1140_v5, %v1061_v16  ;;  %v1845_v16 = vrot.slane %v1807_v6, 1  ;;  %v1384_v6 = vsel %vm3834_vm6, 0, %v1362_v39 }
 0x1e0   : > { %2725 = vmatmul.msk.bf16.gmra.mxu2 %vm1015_vm3, %v1001_v30 }
 0x1e1   : > { %2794 = vmatmul.msk.bf16.gmra.mxu1 %vm1015_vm3, %v1416_v46  ;;  %v1846_v30 = vor.u32 %v1845_v16, %v1804_v2  ;;  %v4212_v46 = vpop.f32.mrf.mxu0 }
 0x1e3   : > { %v1863_v38 = vsel %vm3989_vm9, %v1846_v30, 0 }
 0x1e5   : > { %v4184_v35 = vpop.f32.mrf.mxu3 }
 0x1e6   : > { %v4188_v42 = vpop.f32.mrf.mxu1 }
 0x1e8   : > { %2861 = vmatmul.msk.bf16.gmra.mxu0 %vm1015_vm3, %v1862_v14  ;;  %v1366_v14 = vrot.slane %v1364_v33, 7 }
 0x1e9   : > { %v4224_v2 = vpop.f32.mrf.mxu0 }
 0x1ea   : > { %2769 = vmatmul.msk.bf16.gmra.mxu3 %vm1015_vm3, %v1383_v59 }
 0x1ed   : > { %v1066_v4 = vpop.f32.mrf.mxu3 }
 0x1ee   : > { %v1145_v36 = vpop.f32.mrf.mxu1 }
 0x1ef   : > { %v4201_v41 = vadd.f32 %v1145_v36, %v1066_v4  ;;  %v1369_v36 = vor.u32 %v1367_v29, %v1366_v14 }
 0x1f0   : > { %2726 = vmatmul.msk.bf16.gmra.mxu2 %vm1015_vm3, %v1002_v27  ;;  %v1864_v27 = vsel %vm3989_vm9, %v1848_v1, 0 }
 0x1f1   : > { %2795 = vmatmul.msk.bf16.gmra.mxu1 %vm1015_vm3, %v1417_v19  ;;  %v4234_v16 = vpop.f32.mrf.mxu0  ;;  %v1385_v7 = vsel %vm3834_vm6, 0, %v1369_v36 }
 0x1f3   : > { %v1150_v5 = vpop.f32.mrf.mxu2 }
 0x1f5   : > { %v4214_v23 = vpop.f32.mrf.mxu3 }
 0x1f8   : > { %2862 = vmatmul.msk.bf16.gmra.mxu0 %vm1015_vm3, %v1863_v38 }
 0x1fa   : > { %2770 = vmatmul.msk.bf16.gmra.mxu3 %vm1015_vm3, %v1384_v6 }
 0x1fb   : > { %v1152_v28 = vpop.f32.mrf.mxu2 }
 0x1fd   : > { %v1071_v57 = vpop.f32.mrf.mxu3 }
 0x1fe   : > { %v4222_v45 = vadd.f32 %v1150_v5, %v1071_v57  ;;  %v1826_v57 = vsel %vm3834_vm6, 0, %v3891_v48  ;;  %v1827_v48 = vsel %vm3834_vm6, 0, %v3915_v11 }
 0x200   : > { %2727 = vmatmul.msk.bf16.gmra.mxu2 %vm1015_vm3, %v1003_v44 }
 0x203   : > { %v1155_v59 = vpop.f32.mrf.mxu2 }
 0x205   : > { %v1073_v4 = vpop.f32.mrf.mxu3 }
 0x206   : > { %v4230_v19 = vadd.f32 %v1152_v28, %v1073_v4  ;;  %v4273_v4 = vpop.f32.mrf.mxu0 }
 0x208   : > { %2863 = vmatmul.msk.bf16.gmra.mxu0 %vm1015_vm3, %v1864_v27 }
 0x20a   : > { %2771 = vmatmul.msk.bf16.gmra.mxu3 %vm1015_vm3, %v1385_v7 }
 0x20b   : > { %v1157_v62 = vpop.f32.mrf.mxu2 }
 0x20d   : > { %v1076_v33 = vpop.f32.mrf.mxu3 }
 0x20e   : > { %v4240_v40 = vadd.f32 %v1155_v59, %v1076_v33 }
 0x210   : > { %2832 = vmatmul.msk.bf16.vlgmr.msra.gmra.mxu2 %vm1015_vm3, %v1825_v53 }
 0x213   : > { %v1202_v29 = vpop.f32.mrf.mxu2 }
 0x214   : > { %v1242_v5 = vadd.f32 %v1202_v29, %v4031_v13 }
 0x215   : > { %v1078_v30 = vpop.f32.mrf.mxu3 }
 0x216   : > { %v4250_v39 = vadd.f32 %v1157_v62, %v1078_v30 }
 0x21a   : > { %2844 = vmatmul.msk.bf16.vlgmr.msra.gmra.mxu3 %vm1015_vm3, %v3849_v8 }
 0x21b   : > { %v1204_v38 = vpop.f32.mrf.mxu2 }
 0x21c   : > { %v1243_v6 = vadd.f32 %v1204_v38, %v4045_v61 }
 0x21d   : > { %v1460_v24 = vpop.f32.mrf.mxu3 }
 0x21e   : > { %v4255_v28 = vadd.f32 %v1460_v24, %v1242_v5  ;;  %v1138_v5 = vadd.f32 %v4151_v52, %v4147_v9 }
 0x220   : > { %2833 = vmatmul.msk.bf16.gmra.mxu2 %vm1015_vm3, %v1826_v57 }
 0x223   : > { %v1207_v44 = vpop.f32.mrf.mxu2 }
 0x224   : > { %v1244_v13 = vadd.f32 %v1207_v44, %v4054_v26 }
 0x225   : > { %v1462_v37 = vpop.f32.mrf.mxu3 }
 0x226   : > { %v4262_v14 = vadd.f32 %v1462_v37, %v1243_v6 }
 0x22a   : > { %2845 = vmatmul.msk.bf16.gmra.mxu3 %vm1015_vm3, %v3873_v32  ;;  %v1133_v32 = vadd.f32 %v4103_v49, %v4101_v51 }
 0x22b   : > { %v1209_v8 = vpop.f32.mrf.mxu2 }
 0x22c   : > { %v1245_v61 = vadd.f32 %v1209_v8, %v4068_v22  ;;  %v4282_v22 = vpop.f32.mrf.mxu0 }
 0x22d   : > { %v1465_v59 = vpop.f32.mrf.mxu3 }
 0x22e   : > { %v4267_v1 = vadd.f32 %v1465_v59, %v1244_v13  ;;  %v1143_v13 = vadd.f32 %v4188_v42, %v4184_v35 }
 0x230   : > { %2834 = vmatmul.msk.bf16.gmra.mxu2 %vm1015_vm3, %v1827_v48 }
 0x233   : > { %v1212_v26 = vpop.f32.mrf.mxu2 }
 0x234   : > { %v1246_v36 = vadd.f32 %v1212_v26, %v4080_v12  ;;  %v1828_v12 = vsel %vm3834_vm6, 0, %v3942_v55  ;;  %v4291_v51 = vpop.f32.mrf.mxu0 }
 0x235   : > { %v1467_v27 = vpop.f32.mrf.mxu3 }
 0x236   : > { %v4276_v7 = vadd.f32 %v1467_v27, %v1245_v61 }
 0x23a   : > { %2846 = vmatmul.msk.bf16.gmra.mxu3 %vm1015_vm3, %v3900_v56 }
 0x23b   : > { %v1214_v62 = vpop.f32.mrf.mxu2 }
 0x23c   : > { %v1247_v11 = vadd.f32 %v1214_v62, %v1133_v32  ;;  %v4301_v24 = vpop.f32.mrf.mxu0 }
 0x23d   : > { %v1470_v33 = vpop.f32.mrf.mxu3 }
 0x23e   : > { %v4284_v53 = vadd.f32 %v1470_v33, %v1246_v36 }
 0x240   : > { %2835 = vmatmul.msk.bf16.gmra.mxu2 %vm1015_vm3, %v1828_v12 }
 0x243   : > { %v1217_v17 = vpop.f32.mrf.mxu2 }
 0x244   : > { %v1248_v29 = vadd.f32 %v1217_v17, %v4132_v21  ;;  %v1829_v21 = vsel %vm3834_vm6, 0, %v3967_v20 }
 0x245   : > { %v1472_v49 = vpop.f32.mrf.mxu3 }
 0x246   : > { %v4293_v56 = vadd.f32 %v1472_v49, %v1247_v11 }
 0x24a   : > { %2847 = vmatmul.msk.bf16.gmra.mxu3 %vm1015_vm3, %v3926_v31  ;;  %v4310_v31 = vpop.f32.mrf.mxu0 }
 0x24b   : > { %v1219_v30 = vpop.f32.mrf.mxu2 }
 0x24c   : > { %v1249_v38 = vadd.f32 %v1219_v30, %v1138_v5 }
 0x24d   : > { %v1475_v6 = vpop.f32.mrf.mxu3 }
 0x24e   : > { %v4299_v55 = vadd.f32 %v1475_v6, %v1248_v29 }
 0x250   : > { %2836 = vmatmul.msk.bf16.gmra.mxu2 %vm1015_vm3, %v1829_v21 }
 0x252   : > { %v4322_v59 = vpop.f32.mrf.mxu0 }
 0x253   : > { %v1222_v57 = vpop.f32.mrf.mxu2 }
 0x254   : > { %v1250_v44 = vadd.f32 %v1222_v57, %v4166_v18  ;;  %v1830_v18 = vsel %vm3834_vm6, 0, %v3997_v47 }
 0x255   : > { %v1477_v9 = vpop.f32.mrf.mxu3 }
 0x256   : > { %v4308_v52 = vadd.f32 %v1477_v9, %v1249_v38 }
 0x25a   : > { %2848 = vmatmul.msk.bf16.gmra.mxu3 %vm1015_vm3, %v3952_v10  ;;  %v1147_v10 = vpop.f32.mrf.mxu1  ;;  %v4330_v62 = vpop.f32.mrf.mxu0 }
 0x25b   : > { %v1224_v37 = vpop.f32.mrf.mxu2  ;;  %v1148_v36 = vadd.f32 %v1147_v10, %v4214_v23 }
 0x25c   : > { %v1251_v8 = vadd.f32 %v1224_v37, %v1143_v13 }
 0x25d   : > { %v1480_v61 = vpop.f32.mrf.mxu3 }
 0x25e   : > { %v4316_v20 = vadd.f32 %v1480_v61, %v1250_v44 }
 0x260   : > { %2837 = vmatmul.msk.bf16.gmra.mxu2 %vm1015_vm3, %v1830_v18 }
 0x262   : > { %v1648_v29 = vpop.f32.mrf.mxu1 }
 0x263   : > { %v1227_v48 = vpop.f32.mrf.mxu2 }
 0x264   : > { %v1252_v26 = vadd.f32 %v1227_v48, %v4201_v41  ;;  %v1831_v41 = vsel %vm3834_vm6, 0, %v4130_v25  ;;  %v1832_v25 = vsel %vm3834_vm6, 0, %v4171_v15 }
 0x265   : > { %v1482_v35 = vpop.f32.mrf.mxu3 }
 0x266   : > { %v4325_v42 = vadd.f32 %v1482_v35, %v1251_v8 }
 0x26a   : > { %2849 = vmatmul.msk.bf16.gmra.mxu3 %vm1015_vm3, %v3979_v50  ;;  %v4341_v50 = vpop.f32.mrf.mxu0  ;;  %v1650_v21 = vpop.f32.mrf.mxu1 }
 0x26b   : > { %v1229_v27 = vpop.f32.mrf.mxu2 }
 0x26c   : > { %v1253_v32 = vadd.f32 %v1229_v27, %v1148_v36  ;;  %v1591_v36 = vadd.f32 %v4124_v3, %v4262_v14 }
 0x26d   : > { %v1485_v47 = vpop.f32.mrf.mxu3 }
 0x26e   : > { %v4332_v11 = vadd.f32 %v1485_v47, %v1252_v26  ;;  %v1590_v26 = vadd.f32 %v4092_v43, %v4255_v28 }
 0x270   : > { %2838 = vmatmul.msk.bf16.gmra.mxu2 %vm1015_vm3, %v1831_v41  ;;  %v1688_v10 = vadd.f32 %v1648_v29, %v1590_v26  ;;  %v1689_v41 = vadd.f32 %v1650_v21, %v1591_v36  ;;  %v1592_v29 = vadd.f32 %v4153_v54, %v4267_v1 }
 0x272   : > { %v1653_v60 = vpop.f32.mrf.mxu1 }
 0x273   : > { %v1232_v33 = vpop.f32.mrf.mxu2 }
 0x274   : > { %v1254_v12 = vadd.f32 %v1232_v33, %v4222_v45  ;;  %v2095_v45 = vpop.f32.mrf.mxu0 }
 0x275   : > { %v1487_v23 = vpop.f32.mrf.mxu3 }
 0x276   : > { %v4339_v17 = vadd.f32 %v1487_v23, %v1253_v32 }
 0x27a   : > { %2850 = vmatmul.msk.bf16.gmra.mxu3 %vm1015_vm3, %v4111_v58 }
 0x27b   : > { %v1234_v49 = vpop.f32.mrf.mxu2 }
 0x27c   : > { %v1255_v5 = vadd.f32 %v1234_v49, %v4230_v19  ;;  %v2097_v58 = vpop.f32.mrf.mxu0  ;;  %v4369_v49 = vld [vmem:[%s4642_s4] ss:$0 sm:$0xff] }
 0x27d   : > { %v1490_v30 = vpop.f32.mrf.mxu3 }
 0x27e   : > { %v4346_v38 = vadd.f32 %v1490_v30, %v1254_v12 }
 0x280   : > { %2839 = vmatmul.msk.bf16.gmra.mxu2 %vm1015_vm3, %v1832_v25 }
 0x283   : > { %v1237_v6 = vpop.f32.mrf.mxu2 }
 0x284   : > { %v1256_v57 = vadd.f32 %v1237_v6, %v4240_v40  ;;  %v2100_v61 = vpop.f32.mrf.mxu0  ;;  %v1655_v40 = vpop.f32.mrf.mxu1 }
 0x285   : > { %v1492_v44 = vpop.f32.mrf.mxu3 }
 0x286   : > { %v4353_v9 = vadd.f32 %v1492_v44, %v1255_v5 }
 0x28a   : > { %2851 = vmatmul.msk.bf16.gmra.mxu3 %vm1015_vm3, %v4160_v0 }
 0x28b   : > { %v1239_v19 = vpop.f32.mrf.mxu2 }
 0x28c   : > { %v1257_v13 = vadd.f32 %v1239_v19, %v4250_v39  ;;  %v2102_v27 = vpop.f32.mrf.mxu0  ;;  %v1658_v47 = vpop.f32.mrf.mxu1  ;;  %v1593_v19 = vadd.f32 %v4178_v34, %v4276_v7 }
 0x28d   : > { %v1495_v37 = vpop.f32.mrf.mxu3 }
 0x28e   : > { %v4358_v15 = vadd.f32 %v1495_v37, %v1256_v57  ;;  %v1691_v54 = vadd.f32 %v1655_v40, %v1593_v19 }
 0x293   : > { %v1907_v8 = vpop.f32.mrf.mxu2 }
 0x294   : > { %v1947_v39 = vadd.f32 %v1907_v8, %v1688_v10  ;;  %v2105_v5 = vpop.f32.mrf.mxu0  ;;  %v1660_v6 = vpop.f32.mrf.mxu1 }
 0x295   : > { %v1497_v18 = vpop.f32.mrf.mxu3 }
 0x296   : > { %v4360_v48 = vadd.f32 %v1497_v18, %v1257_v13 }
 0x29b   : > { %v1909_v35 = vpop.f32.mrf.mxu2 }
 0x29c   : > { %v1948_v12 = vadd.f32 %v1909_v35, %v1689_v41  ;;  %v2107_v1 = vpop.f32.mrf.mxu0  ;;  %v1663_v10 = vpop.f32.mrf.mxu1 }
 0x29d   : > { %v1997_v0 = vpop.f32.mrf.mxu3 }
 0x29e   : > { %v2037_v32 = vadd.f32 %v1997_v0, %v1947_v39 }
 0x2a0   : > { %v2135_v23 = vadd.f32 %v2095_v45, %v2037_v32  ;;  %v1690_v45 = vadd.f32 %v1653_v60, %v1592_v29  ;;  %v1594_v60 = vadd.f32 %v4197_v63, %v4284_v53 }
 0x2a2   : > { %v2155_v3 = vadd.f32 %v4369_v49, %v2135_v23  ;;  %v1692_v41 = vadd.f32 %v1658_v47, %v1594_v60  ;;  %v1596_v47 = vadd.f32 %v4224_v2, %v4299_v55 }
 0x2a3   : > { %v1912_v33 = vpop.f32.mrf.mxu2 }
 0x2a4   : > { %v2171_v21 = vmax.f32 %v2155_v3, 0.0  ;;  %v1949_v13 = vadd.f32 %v1912_v33, %v1690_v45  ;;  %v2110_v40 = vpop.f32.mrf.mxu0  ;;  %v1694_v19 = vadd.f32 %v1663_v10, %v1596_v47  ;;  %v1598_v10 = vadd.f32 %v4273_v4, %v4316_v20 }
 0x2a5   : > { %v1999_v43 = vpop.f32.mrf.mxu3 }
 0x2a6   : > { %v2038_v28 = vadd.f32 %v1999_v43, %v1948_v12 }
 0x2a8   : > { %v2136_v14 = vadd.f32 %v2097_v58, %v2038_v28  ;;  %v1665_v28 = vpop.f32.mrf.mxu1 }
 0x2aa   : > { %v2156_v30 = vadd.f32 %v4369_v49, %v2136_v14 }
 0x2ab   : > { %v1914_v25 = vpop.f32.mrf.mxu2 }
 0x2ac   : > { %v2172_v57 = vmax.f32 %v2156_v30, 0.0  ;;  %v1950_v18 = vadd.f32 %v1914_v25, %v1691_v54  ;;  %v2112_v25 = vpop.f32.mrf.mxu0 }
 0x2ad   : > { %v2002_v44 = vpop.f32.mrf.mxu3 }
 0x2ae   : > { %v2187_v37 = vpack.c.bf16 %v2172_v57, %v2171_v21  ;;  %v2039_v8 = vadd.f32 %v2002_v44, %v1949_v13 }
 0x2b0   : > { %2868 = vmatmul.msk.bf16.vlgmr.msrb.gmra.mxu1 %vm1015_vm3, %v2187_v37  ;;  %v2137_v26 = vadd.f32 %v2100_v61, %v2039_v8  ;;  %v1595_v61 = vadd.f32 %v4212_v46, %v4293_v56  ;;  %v1668_v46 = vpop.f32.mrf.mxu1 }
 0x2b2   : > { %v2157_v36 = vadd.f32 %v4369_v49, %v2137_v26  ;;  %v1693_v63 = vadd.f32 %v1660_v6, %v1595_v61 }
 0x2b3   : > { %v1917_v58 = vpop.f32.mrf.mxu2 }
 0x2b4   : > { %v2173_v32 = vmax.f32 %v2157_v36, 0.0  ;;  %v1951_v23 = vadd.f32 %v1917_v58, %v1692_v41  ;;  %v2115_v2 = vpop.f32.mrf.mxu0 }
 0x2b5   : > { %v2004_v35 = vpop.f32.mrf.mxu3 }
 0x2b6   : > { %v2040_v0 = vadd.f32 %v2004_v35, %v1950_v18 }
 0x2b8   : > { %v2138_v39 = vadd.f32 %v2102_v27, %v2040_v0 }
 0x2ba   : > { %v2158_v34 = vadd.f32 %v4369_v49, %v2138_v39 }
 0x2bb   : > { %v1919_v7 = vpop.f32.mrf.mxu2 }
 0x2bc   : > { %v2174_v33 = vmax.f32 %v2158_v34, 0.0  ;;  %v1952_v27 = vadd.f32 %v1919_v7, %v1693_v63  ;;  %v1696_v7 = vadd.f32 %v1668_v46, %v1598_v10  ;;  %v1601_v46 = vadd.f32 %v4301_v24, %v4339_v17 }
 0x2bd   : > { %v2007_v12 = vpop.f32.mrf.mxu3  ;;  %v1603_v10 = vadd.f32 %v4322_v59, %v4353_v9 }
 0x2be   : > { %v2188_v43 = vpack.c.bf16 %v2174_v33, %v2173_v32  ;;  %v2041_v29 = vadd.f32 %v2007_v12, %v1951_v23 }
 0x2c0   : > { %2869 = vmatmul.msk.bf16.gmra.mxu1 %vm1015_vm3, %v2188_v43  ;;  %v2139_v3 = vadd.f32 %v2105_v5, %v2041_v29  ;;  %v1597_v5 = vadd.f32 %v4234_v16, %v4308_v52  ;;  %v2117_v52 = vpop.f32.mrf.mxu0 }
 0x2c2   : > { %v2159_v21 = vadd.f32 %v4369_v49, %v2139_v3  ;;  %v1695_v55 = vadd.f32 %v1665_v28, %v1597_v5  ;;  %v1600_v3 = vadd.f32 %v4291_v51, %v4332_v11 }
 0x2c3   : > { %v1922_v53 = vpop.f32.mrf.mxu2 }
 0x2c4   : > { %v2175_v44 = vmax.f32 %v2159_v21, 0.0  ;;  %v1953_v37 = vadd.f32 %v1922_v53, %v1694_v19 }
 0x2c5   : > { %v2009_v14 = vpop.f32.mrf.mxu3 }
 0x2c6   : > { %v2042_v30 = vadd.f32 %v2009_v14, %v1952_v27 }
 0x2c8   : > { %v2140_v45 = vadd.f32 %v2107_v1, %v2042_v30  ;;  %v1670_v1 = vpop.f32.mrf.mxu1  ;;  %v2120_v29 = vpop.f32.mrf.mxu0 }
 0x2ca   : > { %v2160_v56 = vadd.f32 %v4369_v49, %v2140_v45 }
 0x2cb   : > { %v1924_v57 = vpop.f32.mrf.mxu2 }
 0x2cc   : > { %v2176_v13 = vmax.f32 %v2160_v56, 0.0  ;;  %v1954_v18 = vadd.f32 %v1924_v57, %v1695_v55 }
 0x2cd   : > { %v2012_v6 = vpop.f32.mrf.mxu3 }
 0x2ce   : > { %v2189_v8 = vpack.c.bf16 %v2176_v13, %v2175_v44  ;;  %v2043_v54 = vadd.f32 %v2012_v6, %v1953_v37 }
 0x2d0   : > { %2870 = vmatmul.msk.bf16.gmra.mxu1 %vm1015_vm3, %v2189_v8  ;;  %v2141_v26 = vadd.f32 %v2110_v40, %v2043_v54  ;;  %v1673_v33 = vpop.f32.mrf.mxu1  ;;  %v1599_v40 = vadd.f32 %v4282_v22, %v4325_v42  ;;  %v2122_v44 = vpop.f32.mrf.mxu0  ;;  %v1602_v54 = vadd.f32 %v4310_v31, %v4346_v38 }
 0x2d1   : > { %v1698_v47 = vadd.f32 %v1673_v33, %v1600_v3  ;;  %v1604_v33 = vadd.f32 %v4330_v62, %v4358_v15 }
 0x2d2   : > { %v2161_v60 = vadd.f32 %v4369_v49, %v2141_v26  ;;  %v1697_v4 = vadd.f32 %v1670_v1, %v1599_v40 }
 0x2d3   : > { %v1927_v58 = vpop.f32.mrf.mxu2 }
 0x2d4   : > { %v2177_v34 = vmax.f32 %v2161_v60, 0.0  ;;  %v1955_v12 = vadd.f32 %v1927_v58, %v1696_v7 }
 0x2d5   : > { %v2014_v35 = vpop.f32.mrf.mxu3 }
 0x2d6   : > { %v2044_v0 = vadd.f32 %v2014_v35, %v1954_v18 }
 0x2d8   : > { %v2142_v36 = vadd.f32 %v2112_v25, %v2044_v0  ;;  %v1675_v27 = vpop.f32.mrf.mxu1  ;;  %v2125_v24 = vpop.f32.mrf.mxu0 }
 0x2d9   : > { %v1699_v11 = vadd.f32 %v1675_v27, %v1601_v46  ;;  %v4427_v46 = vld [vmem:[%s4643_s15] ss:$0 sm:$0xff] }
 0x2da   : > { %v2162_v16 = vadd.f32 %v4369_v49, %v2142_v36 }
 0x2db   : > { %v1929_v39 = vpop.f32.mrf.mxu2 }
 0x2dc   : > { %v2178_v32 = vmax.f32 %v2162_v16, 0.0  ;;  %v1956_v43 = vadd.f32 %v1929_v39, %v1697_v4 }
 0x2dd   : > { %v2017_v41 = vpop.f32.mrf.mxu3 }
 0x2de   : > { %v2190_v61 = vpack.c.bf16 %v2178_v32, %v2177_v34  ;;  %v2045_v23 = vadd.f32 %v2017_v41, %v1955_v12 }
 0x2e0   : > { %2871 = vmatmul.msk.bf16.gmra.mxu1 %vm1015_vm3, %v2190_v61  ;;  %v2143_v28 = vadd.f32 %v2115_v2, %v2045_v23  ;;  %v1678_v51 = vpop.f32.mrf.mxu1  ;;  %v2127_v38 = vpop.f32.mrf.mxu0 }
 0x2e1   : > { %v1700_v18 = vadd.f32 %v1678_v51, %v1602_v54 }
 0x2e2   : > { %v2163_v14 = vadd.f32 %v4369_v49, %v2143_v28 }
 0x2e3   : > { %v1932_v20 = vpop.f32.mrf.mxu2 }
 0x2e4   : > { %v2179_v25 = vmax.f32 %v2163_v14, 0.0  ;;  %v1957_v56 = vadd.f32 %v1932_v20, %v1698_v47 }
 0x2e5   : > { %v2019_v63 = vpop.f32.mrf.mxu3 }
 0x2e6   : > { %v2046_v53 = vadd.f32 %v2019_v63, %v1956_v43  ;;  %v1605_v43 = vadd.f32 %v4341_v50, %v4360_v48 }
 0x2e8   : > { %v2144_v30 = vadd.f32 %v2117_v52, %v2046_v53  ;;  %v1680_v58 = vpop.f32.mrf.mxu1  ;;  %v2130_v4 = vpop.f32.mrf.mxu0 }
 0x2e9   : > { %v1701_v31 = vadd.f32 %v1680_v58, %v1603_v10  ;;  %v2976_v10 = vld [vmem:[%s3731_s12 + $0x10] sm:$0xff]  }
 0x2ea   : > { %v2164_v22 = vadd.f32 %v4369_v49, %v2144_v30 }
 0x2eb   : > { %v1934_v42 = vpop.f32.mrf.mxu2 }
 0x2ec   : > { %v2180_v21 = vmax.f32 %v2164_v22, 0.0  ;;  %v1958_v6 = vadd.f32 %v1934_v42, %v1699_v11 }
 0x2ed   : > { %v2022_v45 = vpop.f32.mrf.mxu3 }
 0x2ee   : > { %v2191_v57 = vpack.c.bf16 %v2180_v21, %v2179_v25  ;;  %v2047_v19 = vadd.f32 %v2022_v45, %v1957_v56  ;;  %v2944_v45 = vld [vmem:[%s3731_s12] sm:$0xff]  }
 0x2ef   : > { %v2945_v56 = vunpack.c.l.bf16 %v2944_v45  ;;  %v2946_v11 = vunpack.c.h.bf16 %v2944_v45  ;;  %v2979_v45 = vld [vmem:[%s3731_s12 + $0x28] sm:$0xff]  }
 0x2f0   : > { %2872 = vmatmul.msk.bf16.gmra.mxu1 %vm1015_vm3, %v2191_v57  ;;  %v2145_v5 = vadd.f32 %v2120_v29, %v2047_v19  ;;  %v1683_v32 = vpop.f32.mrf.mxu1  ;;  %v2132_v22 = vpop.f32.mrf.mxu0 }
 0x2f1   : > { %v1702_v61 = vadd.f32 %v1683_v32, %v1604_v33 }
 0x2f2   : > { %v2165_v2 = vadd.f32 %v4369_v49, %v2145_v5 }
 0x2f3   : > { %v1937_v13 = vpop.f32.mrf.mxu2 }
 0x2f4   : > { %v2181_v1 = vmax.f32 %v2165_v2, 0.0  ;;  %v1959_v60 = vadd.f32 %v1937_v13, %v1700_v18 }
 0x2f5   : > { %v2024_v37 = vpop.f32.mrf.mxu3 }
 0x2f6   : > { %v2048_v8 = vadd.f32 %v2024_v37, %v1958_v6  ;;  %v2975_v37 = vld [vmem:[%s3731_s12 + $0x8] sm:$0xff]  }
 0x2f7   : > { %v2949_v2 = vunpack.c.l.bf16 %v2975_v37  ;;  %v2950_v18 = vunpack.c.h.bf16 %v2975_v37 }
 0x2f8   : > { %v2146_v55 = vadd.f32 %v2122_v44, %v2048_v8  ;;  %v1685_v62 = vpop.f32.mrf.mxu1 }
 0x2f9   : > { %v1703_v53 = vadd.f32 %v1685_v62, %v1605_v43 }
 0x2fa   : > { %v2166_v17 = vadd.f32 %v4369_v49, %v2146_v55 }
 0x2fb   : > { %v1939_v35 = vpop.f32.mrf.mxu2 }
 0x2fc   : > { %v2182_v26 = vmax.f32 %v2166_v17, 0.0  ;;  %v1960_v52 = vadd.f32 %v1939_v35, %v1701_v31 }
 0x2fd   : > { %v2027_v0 = vpop.f32.mrf.mxu3 }
 0x2fe   : > { %v2192_v36 = vpack.c.bf16 %v2182_v26, %v2181_v1  ;;  %v2049_v16 = vadd.f32 %v2027_v0, %v1959_v60 }
 0x300   : > { %2873 = vmatmul.msk.bf16.gmra.mxu1 %vm1015_vm3, %v2192_v36  ;;  %v2147_v39 = vadd.f32 %v2125_v24, %v2049_v16  ;;  %v2953_v16 = vunpack.c.l.bf16 %v2976_v10 }
 0x302   : > { %v2167_v40 = vadd.f32 %v4369_v49, %v2147_v39 }
 0x303   : > { %v1942_v41 = vpop.f32.mrf.mxu2 }
 0x304   : > { %v2183_v9 = vmax.f32 %v2167_v40, 0.0  ;;  %v1961_v28 = vadd.f32 %v1942_v41, %v1702_v61  ;;  %v2977_v40 = vld [vmem:[%s3731_s12 + $0x18] sm:$0xff]  }
 0x305   : > { %v2029_v34 = vpop.f32.mrf.mxu3 }
 0x306   : > { %v2050_v7 = vadd.f32 %v2029_v34, %v1960_v52 }
 0x308   : > { %v2148_v12 = vadd.f32 %v2127_v38, %v2050_v7  ;;  %v2954_v7 = vunpack.c.h.bf16 %v2976_v10 }
 0x30a   : > { %v2168_v59 = vadd.f32 %v4369_v49, %v2148_v12 }
 0x30b   : > { %v1944_v15 = vpop.f32.mrf.mxu2 }
 0x30c   : > { %v2184_v23 = vmax.f32 %v2168_v59, 0.0  ;;  %v1962_v27 = vadd.f32 %v1944_v15, %v1703_v53  ;;  %v2978_v15 = vld [vmem:[%s3731_s12 + $0x20] sm:$0xff]  }
 0x30d   : > { %v2032_v20 = vpop.f32.mrf.mxu3 }
 0x30e   : > { %v2193_v29 = vpack.c.bf16 %v2184_v23, %v2183_v9  ;;  %v2051_v63 = vadd.f32 %v2032_v20, %v1961_v28  ;;  %v2957_v9 = vunpack.c.l.bf16 %v2977_v40  ;;  %v2958_v28 = vunpack.c.h.bf16 %v2977_v40 }
 0x310   : > { %2874 = vmatmul.msk.bf16.gmra.mxu1 %vm1015_vm3, %v2193_v29  ;;  %v2149_v3 = vadd.f32 %v2130_v4, %v2051_v63 }
 0x312   : > { %v2169_v42 = vadd.f32 %v4369_v49, %v2149_v3  ;;  %v2961_v3 = vunpack.c.l.bf16 %v2978_v15 }
 0x314   : > { %v2185_v50 = vmax.f32 %v2169_v42, 0.0 }
 0x315   : > { %v2034_v14 = vpop.f32.mrf.mxu3 }
 0x316   : > { %v2052_v30 = vadd.f32 %v2034_v14, %v1962_v27 }
 0x318   : > { %v2150_v25 = vadd.f32 %v2132_v22, %v2052_v30 }
 0x31a   : > { %v2170_v47 = vadd.f32 %v4369_v49, %v2150_v25 }
 0x31c   : > { %v2186_v48 = vmax.f32 %v2170_v47, 0.0  ;;  %v2962_v47 = vunpack.c.h.bf16 %v2978_v15 }
 0x31e   : > { %v2194_v21 = vpack.c.bf16 %v2186_v48, %v2185_v50 }
 0x320   : > { %2875 = vmatmul.msk.bf16.gmra.mxu1 %vm1015_vm3, %v2194_v21 }
 0x32d   : > { %v2240_v57 = vpop.f32.mrf.mxu1 }
 0x32e   : > { %v2241_v44 = vadd.f32 %v4427_v46, %v2240_v57 }
 0x330   : > { %v2312_v19 = vadd.f32 %v2945_v56, %v2241_v44  ;;  %v2965_v44 = vunpack.c.l.bf16 %v2979_v45 }
 0x332   : > { %v2328_v51 = vmax.f32 %v2312_v19, 0.0 }
 0x334   : > { %v2344_v49 = vpack.c.bf16 %v2328_v51, %v2328_v51 }
 0x335   : > { %v2242_v13 = vpop.f32.mrf.mxu1 }
 0x336   : > { %2361 = vst.msk [vmem:[%s4432_s25] sm:$0xf] %vm2360_vm11, %v2344_v49  ;;  %v2243_v6 = vadd.f32 %v4427_v46, %v2242_v13 }
 0x338   : > { %v2313_v5 = vadd.f32 %v2946_v11, %v2243_v6  ;;  %v2966_v6 = vunpack.c.h.bf16 %v2979_v45 }
 0x33a   : > { %v2329_v8 = vmax.f32 %v2313_v5, 0.0 }
 0x33c   : > { %v2345_v54 = vpack.c.bf16 %v2329_v8, %v2329_v8 }
 0x33d   : > { %v2245_v55 = vpop.f32.mrf.mxu1 }
 0x33e   : > { %2362 = vst.msk [vmem:[%s4432_s25 + $0x4] sm:$0xf] %vm2360_vm11, %v2345_v54  ;;  %v2246_v24 = vadd.f32 %v4427_v46, %v2245_v55  ;;  %v2980_v54 = vld [vmem:[%s3731_s12 + $0x30] sm:$0xff]  }
 0x340   : > { %v2314_v17 = vadd.f32 %v2949_v2, %v2246_v24  ;;  %v2969_v24 = vunpack.c.l.bf16 %v2980_v54 }
 0x342   : > { %v2330_v58 = vmax.f32 %v2314_v17, 0.0 }
 0x344   : > { %v2346_v1 = vpack.c.bf16 %v2330_v58, %v2330_v58 }
 0x345   : > { %v2247_v26 = vpop.f32.mrf.mxu1 }
 0x346   : > { %2363 = vst.msk [vmem:[%s4432_s25 + $0x8] sm:$0xf] %vm2360_vm11, %v2346_v1  ;;  %v2248_v35 = vadd.f32 %v4427_v46, %v2247_v26 }
 0x348   : > { %v2315_v0 = vadd.f32 %v2950_v18, %v2248_v35  ;;  %v2970_v35 = vunpack.c.h.bf16 %v2980_v54 }
 0x34a   : > { %v2331_v60 = vmax.f32 %v2315_v0, 0.0 }
 0x34c   : > { %v2347_v36 = vpack.c.bf16 %v2331_v60, %v2331_v60 }
 0x34d   : > { %v2250_v31 = vpop.f32.mrf.mxu1 }
 0x34e   : > { %2364 = vst.msk [vmem:[%s4432_s25 + $0xc] sm:$0xf] %vm2360_vm11, %v2347_v36  ;;  %v2251_v38 = vadd.f32 %v4427_v46, %v2250_v31  ;;  %v2981_v36 = vld [vmem:[%s3731_s12 + $0x38] sm:$0xff]  }
 0x350   : > { %v2316_v52 = vadd.f32 %v2953_v16, %v2251_v38  ;;  %v2973_v38 = vunpack.c.l.bf16 %v2981_v36 }
 0x352   : > { %v2332_v39 = vmax.f32 %v2316_v52, 0.0 }
 0x354   : > { %v2348_v34 = vpack.c.bf16 %v2332_v39, %v2332_v39 }
 0x355   : > { %v2252_v32 = vpop.f32.mrf.mxu1 }
 0x356   : > { %2365 = vst.msk [vmem:[%s4432_s25 + $0x10] sm:$0xf] %vm2360_vm11, %v2348_v34  ;;  %v2253_v41 = vadd.f32 %v4427_v46, %v2252_v32 }
 0x358   : > { %v2317_v33 = vadd.f32 %v2954_v7, %v2253_v41  ;;  %v2974_v41 = vunpack.c.h.bf16 %v2981_v36 }
 0x35a   : > { %v2333_v12 = vmax.f32 %v2317_v33, 0.0 }
 0x35c   : > { %v2349_v59 = vpack.c.bf16 %v2333_v12, %v2333_v12 }
 0x35d   : > { %v2255_v61 = vpop.f32.mrf.mxu1 }
 0x35e   : > { %2366 = vst.msk [vmem:[%s4432_s25 + $0x14] sm:$0xf] %vm2360_vm11, %v2349_v59  ;;  %v2256_v23 = vadd.f32 %v4427_v46, %v2255_v61 }
 0x360   : > { %v2318_v4 = vadd.f32 %v2957_v9, %v2256_v23 }
 0x362   : > { %v2334_v20 = vmax.f32 %v2318_v4, 0.0 }
 0x364   : > { %v2350_v43 = vpack.c.bf16 %v2334_v20, %v2334_v20 }
 0x365   : > { %v2257_v29 = vpop.f32.mrf.mxu1 }
 0x366   : > { %2367 = vst.msk [vmem:[%s4432_s25 + $0x18] sm:$0xf] %vm2360_vm11, %v2350_v43  ;;  %v2258_v63 = vadd.f32 %v4427_v46, %v2257_v29 }
 0x368   : > { %v2319_v62 = vadd.f32 %v2958_v28, %v2258_v63 }
 0x36a   : > { %v2335_v53 = vmax.f32 %v2319_v62, 0.0 }
 0x36c   : > { %v2351_v27 = vpack.c.bf16 %v2335_v53, %v2335_v53 }
 0x36d   : > { %v2260_v14 = vpop.f32.mrf.mxu1 }
 0x36e   : > { %2368 = vst.msk [vmem:[%s4432_s25 + $0x1c] sm:$0xf] %vm2360_vm11, %v2351_v27  ;;  %v2261_v30 = vadd.f32 %v4427_v46, %v2260_v14 }
 0x370   : > { %v2320_v22 = vadd.f32 %v2961_v3, %v2261_v30 }
 0x372   : > { %v2336_v42 = vmax.f32 %v2320_v22, 0.0 }
 0x374   : > { %v2352_v25 = vpack.c.bf16 %v2336_v42, %v2336_v42 }
 0x375   : > { %v2262_v50 = vpop.f32.mrf.mxu1 }
 0x376   : > { %2369 = vst.msk [vmem:[%s4432_s25 + $0x20] sm:$0xf] %vm2360_vm11, %v2352_v25  ;;  %v2263_v48 = vadd.f32 %v4427_v46, %v2262_v50 }
 0x378   : > { %v2321_v21 = vadd.f32 %v2962_v47, %v2263_v48 }
 0x37a   : > { %v2337_v56 = vmax.f32 %v2321_v21, 0.0 }
 0x37c   : > { %v2353_v57 = vpack.c.bf16 %v2337_v56, %v2337_v56 }
 0x37d   : > { %v2265_v19 = vpop.f32.mrf.mxu1 }
 0x37e   : > { %2370 = vst.msk [vmem:[%s4432_s25 + $0x24] sm:$0xf] %vm2360_vm11, %v2353_v57  ;;  %v2266_v51 = vadd.f32 %v4427_v46, %v2265_v19 }
 0x380   : > { %v2322_v49 = vadd.f32 %v2965_v44, %v2266_v51 }
 0x382   : > { %v2338_v11 = vmax.f32 %v2322_v49, 0.0 }
 0x384   : > { %v2354_v13 = vpack.c.bf16 %v2338_v11, %v2338_v11 }
 0x385   : > { %v2267_v5 = vpop.f32.mrf.mxu1 }
 0x386   : > { %2371 = vst.msk [vmem:[%s4432_s25 + $0x28] sm:$0xf] %vm2360_vm11, %v2354_v13  ;;  %v2268_v37 = vadd.f32 %v4427_v46, %v2267_v5 }
 0x388   : > { %v2323_v8 = vadd.f32 %v2966_v6, %v2268_v37 }
 0x38a   : > { %v2339_v2 = vmax.f32 %v2323_v8, 0.0 }
 0x38c   : > { %v2355_v55 = vpack.c.bf16 %v2339_v2, %v2339_v2 }
 0x38d   : > { %v2270_v17 = vpop.f32.mrf.mxu1 }
 0x38e   : > { %2372 = vst.msk [vmem:[%s4432_s25 + $0x2c] sm:$0xf] %vm2360_vm11, %v2355_v55  ;;  %v2271_v58 = vadd.f32 %v4427_v46, %v2270_v17 }
 0x390   : > { %v2324_v1 = vadd.f32 %v2969_v24, %v2271_v58 }
 0x392   : > { %v2340_v18 = vmax.f32 %v2324_v1, 0.0 }
 0x394   : > { %v2356_v26 = vpack.c.bf16 %v2340_v18, %v2340_v18 }
 0x395   : > { %v2272_v0 = vpop.f32.mrf.mxu1 }
 0x396   : > { %2373 = vst.msk [vmem:[%s4432_s25 + $0x30] sm:$0xf] %vm2360_vm11, %v2356_v26  ;;  %v2273_v10 = vadd.f32 %v4427_v46, %v2272_v0 }
 0x398   : > { %v2325_v60 = vadd.f32 %v2970_v35, %v2273_v10 }
 0x39a   : > { %v2341_v16 = vmax.f32 %v2325_v60, 0.0 }
 0x39c   : > { %v2357_v31 = vpack.c.bf16 %v2341_v16, %v2341_v16 }
 0x39d   : > { %v2275_v52 = vpop.f32.mrf.mxu1 }
 0x39e   : > { %2374 = vst.msk [vmem:[%s4432_s25 + $0x34] sm:$0xf] %vm2360_vm11, %v2357_v31  ;;  %v2276_v39 = vadd.f32 %v4427_v46, %v2275_v52 }
 0x3a0   : > { %v2326_v34 = vadd.f32 %v2973_v38, %v2276_v39 }
 0x3a2   : > { %v2342_v7 = vmax.f32 %v2326_v34, 0.0 }
 0x3a4   : > { %v2358_v32 = vpack.c.bf16 %v2342_v7, %v2342_v7 }
 0x3a5   : > { %v2277_v33 = vpop.f32.mrf.mxu1 }
 0x3a6   : > { %2375 = vst.msk [vmem:[%s4432_s25 + $0x38] sm:$0xf] %vm2360_vm11, %v2358_v32  ;;  %v2278_v40 = vadd.f32 %v4427_v46, %v2277_v33 }
 0x3a8   : > { %v2327_v12 = vadd.f32 %v2974_v41, %v2278_v40 }
 0x3aa   : > { %v2343_v59 = vmax.f32 %v2327_v12, 0.0 }
 0x3ac   : > { %v2359_v9 = vpack.c.bf16 %v2343_v59, %v2343_v59 }
 0x3ae   : > { %2376 = vst.msk [vmem:[%s4432_s25 + $0x3c] sm:$0xf] %vm2360_vm11, %v2359_v9 }
 0x3af   : > { %3289 = shalt.err (!%p3286_p13)
}
 0x3b0   : > { %s3425_s18 = smov 64   ;;  %s3426_s25 = smov 4  }
 0x3b1   : > { %2997 = dma.vmem_to_hbm [thread:$0]  (%p3662_p10), %s2394_s2, 1024, %s2396_s17, %s2378_s20, %s3425_s18, %s3425_s18, %s3426_s25  }
 0x3b2 PF: > { %s4648_s24 = sld [smem:[#allocation18_spill]]  ;;  %p3020_p8 = scmp.ge.s32.totalorder %s3420_s22, 2 }
 0x3b4   : > { %p3014_p1 = pnand %p3020_p8, %p3666_p6 }
 0x3b6   : > { %p3015_p9 = pneg %p3014_p1 }
 0x3b8   : > { %s2410_s8 = sand.u32 1, %s4648_s24  }
 0x3b9   : > { %s2411_s23 = scalar_lea.sflag [#allocation5], %s2410_s8 }
 0x3ba   : > { %3363 = dma.done.wait (%p3015_p9), %s2411_s23, 1024  }
 0x3bb   : > { %3365 = vsyncadd (%p3015_p9), %s2411_s23, 4294966272  ;;  %s29_s22 = sadd.s32 1, %s3420_s22   ;;  %s4651_s12 = smov %s3708_s30 }
 0x3bc   : > { %p4510_p11 = scmp.ge.s32.totalorder %s29_s22, 6   ;;  %s4652_s9 = sld [smem:[#allocation17_spill]] }
 0x3bd   : > { %s4653_s14 = sld [smem:[#allocation27_spill]]  ;;  %s4660_s30 = smov %s3372_s10 }
 0x3be   : > { %s4654_s6 = sld [smem:[#allocation19_spill]]  ;;  %s4661_s10 = smov %s3376_s11 }
 0x3bf   : > { %s4655_s17 = sld [smem:[#allocation28_spill]]  ;;  %s4662_s11 = smov %s4651_s12 }
 0x3c0   : > { %s4656_s18 = sld [smem:[#allocation22_spill]]  ;;  %s4663_s12 = smov %s3384_s13 }
 0x3c1   : > { %s4657_s19 = sld [smem:[#allocation23_spill]]  ;;  %s4665_s15 = smov %s3396_s16 }
 0x3c2   : > { %s4658_s20 = sld [smem:[#allocation24_spill]]  ;;  %s4664_s13 = smov %s4652_s9 }
 0x3c3   : > { %s4659_s21 = sld [smem:[#allocation25_spill]]  ;;  %28 = sbr.rel (!%p4510_p11) target bundleno = 24 (0x18), region = 140 }
 0x3c4   : > { %s4666_s16 = smov %s4654_s6 }
 0x3c8   :  { %2417 = vsyncpa [#allocation4], 1 }
 0x3c9   :  { %2419 = vsyncpa [#allocation4 + $0x1], 1 }
 0x3ca   :  { %2420 = vsyncpa [#allocation7], 1 }
 0x3cb   :  { %2422 = vsyncpa [#allocation7 + $0x1], 1 }
 0x3cc   :  { %2423 = vsyncpa [#allocation10], 1 }
 0x3cd   :  { %2424 = vsyncpa [#allocation5], 1 }
 0x3ce   :  { %2426 = vsyncpa [#allocation5 + $0x1], 1 }

</bundles_post_ra>
